<compile_context>
chip_gen: v6e
topology: v6e:2x2x1
jax: 0.10.0
libtpu: 0.0.40
codegen_flags: <defaults>
</compile_context>

<pallas_src>
import functools

import jax
import jax.numpy as jnp
from jax import lax
from jax.experimental import pallas as pl
from jax.experimental.pallas import tpu as pltpu


# ------------------------------------------------------------------
# Pallas kernel: bilinear grid_sample as a hat-function-weighted MXU matmul
# ------------------------------------------------------------------
def grid_sample_kernel(c_ref, x_ref, o_ref, *, H, W, Hc, num_k, mxu_dtype, separable):
    coords = c_ref[0, 0]                                    # (2, TN)
    TN = coords.shape[1]

    # Folded grid_sample algebra: sample coord = low-res base + offset, clamped to
    # the border.  Clamping makes the hat weight of any out-of-image neighbor zero,
    # exactly reproducing padding_mode='border'.
    ix = jnp.clip(coords[0:1, :], 0.0, float(W - 1))        # (1, TN)
    iy = jnp.clip(coords[1:2, :], 0.0, float(H - 1))        # (1, TN)

    k = pl.program_id(3)
    row0 = k * Hc                                           # first source row of this HW-chunk

    if separable:
        # Separable hat-function weights, built at O((Hc + W) * TN) and expanded to
        # (Hc*W, TN) with a single outer-product multiply (the only full-size VPU op).
        yr = (lax.broadcasted_iota(jnp.int32, (Hc, 1), 0) + row0).astype(jnp.float32)
        xr = lax.broadcasted_iota(jnp.int32, (W, 1), 0).astype(jnp.float32)
        wy = jnp.maximum(0.0, 1.0 - jnp.abs(yr - iy)).astype(mxu_dtype)   # (Hc, TN)
        wx = jnp.maximum(0.0, 1.0 - jnp.abs(xr - ix)).astype(mxu_dtype)   # (W,  TN)
        w_full = (wy[:, None, :] * wx[None, :, :]).reshape(Hc * W, TN)
    else:
        # W % 8 != 0: avoid the sublane-collapse reshape; still hat-function form.
        # Row index via an exact float floor (no integer division): (r + 0.5)/W is
        # always >= 1/(2W) away from an integer, far beyond f32 rounding error for
        # any realistic H*W, so the floor never flips.
        r = (lax.broadcasted_iota(jnp.int32, (Hc * W, 1), 0)
             + row0 * W).astype(jnp.float32)                # (Hc*W, 1) global flat index
        yr = jnp.floor((r + 0.5) * (1.0 / W))
        xr = r - yr * W
        wy = jnp.maximum(0.0, 1.0 - jnp.abs(yr - iy))       # (Hc*W, TN)
        wx = jnp.maximum(0.0, 1.0 - jnp.abs(xr - ix))       # (Hc*W, TN)
        w_full = (wy * wx).astype(mxu_dtype)

    xg = x_ref[0, 0]                                        # (Cg, Hc*W), already mxu_dtype
    acc = jnp.dot(xg, w_full, preferred_element_type=jnp.float32)

    if num_k == 1:
        o_ref[0, 0] = acc.astype(o_ref.dtype)
    else:
        # K-axis (HW-chunk) reduction: accumulate directly into the resident f32
        # output block (same block index across k; k is the innermost, "arbitrary" axis).
        @pl.when(k == 0)
        def _():
            o_ref[0, 0] = acc.astype(o_ref.dtype)

        @pl.when(k > 0)
        def _():
            o_ref[0, 0] = o_ref[0, 0] + acc.astype(o_ref.dtype)


# ------------------------------------------------------------------
# VMEM-aware tiling plan
# ------------------------------------------------------------------
def _round_up(a, m):
    return -(-a // m) * m


def _plan(OHW, H, W, Cg, x_itemsize, separable, max_tile_lanes=None, force_hc=None):
    """Pick (tile, padded OHW, H-chunk Hc, vmem_limit) so all (Hc*W x tile) temps fit VMEM."""
    try:
        cap = int(getattr(pltpu.get_tpu_info(), "vmem_capacity_bytes", 64 << 20))
    except Exception:  # interpret mode / older runtimes
        cap = 64 << 20
    vmem_limit = int(min(cap // 2, 64 << 20))   # generation-aware (v7x: 32 MiB, v5e/v6e: 64 MiB)
    budget = vmem_limit // 2                    # headroom for pipeline buffers / compiler scratch
    n_live = 3 if separable else 5              # live (Hc*W, TN) f32-equivalent temporaries

    def bytes_needed(hc, tn):
        hw_c = hc * W
        return (n_live * 4 * hw_c * tn           # weight-construction temporaries
                + 2 * Cg * hw_c * x_itemsize     # double-buffered X block
                + 2 * Cg * tn * 4                # double-buffered output block
                + 2 * 2 * tn * 4)                # double-buffered coords block

    ohw128 = _round_up(OHW, 128)
    cap_tile = 2048 if max_tile_lanes is None else max(128, (max_tile_lanes // 128) * 128)
    cap_tile = min(cap_tile, ohw128)

    if force_hc is not None:
        hc_cands = [force_hc]
    else:
        # K = 1 first (resident X); otherwise H-chunks whose flattened width is a
        # multiple of 128 (BlockSpec last-dim constraint when not the full array dim).
        hc_cands = [H] + [h for h in range(H - 1, 0, -1)
                          if H % h == 0 and (h * W) % 128 == 0]

    for hc in hc_cands:
        tn = cap_tile
        while tn > 128 and bytes_needed(hc, tn) > budget:
            tn -= 128
        if bytes_needed(hc, tn) <= budget:
            return tn, _round_up(OHW, tn), hc, vmem_limit
    # Pathological fallback: smallest chunk, smallest tile; let the compiler decide.
    return 128, ohw128, hc_cands[-1], vmem_limit


def grid_sample_call(x_grp, coords, *, B, G, Cg, H, W, Hc, tile, ohw_pad,
                     mxu_dtype, separable, vmem_limit):
    HW_c = Hc * W
    T = ohw_pad // tile
    K = H // Hc
    kern = functools.partial(grid_sample_kernel, H=H, W=W, Hc=Hc, num_k=K,
                             mxu_dtype=mxu_dtype, separable=separable)
    # Megacore split over B/G keeps the resident X block reuse intact on v7x; the
    # tile axis only stays "parallel" when there is nothing else to split.
    t_sem = "parallel" if B * G < 2 else "arbitrary"
    return pl.pallas_call(
        kern,
        out_shape=jax.ShapeDtypeStruct((B, G, Cg, ohw_pad), jnp.float32),
        grid=(B, G, T, K),
        in_specs=[
            pl.BlockSpec((1, 1, 2, tile), lambda b, g, t, k: (b, g, 0, t)),    # coords (streamed)
            pl.BlockSpec((1, 1, Cg, HW_c), lambda b, g, t, k: (b, g, 0, k)),   # X (resident if K==1)
        ],
        out_specs=pl.BlockSpec((1, 1, Cg, tile), lambda b, g, t, k: (b, g, 0, t)),
        compiler_params=pltpu.CompilerParams(
            dimension_semantics=("parallel", "parallel", t_sem, "arbitrary"),
            vmem_limit_bytes=vmem_limit),
    )(coords, x_grp)


# ------------------------------------------------------------------
# Parameter / buffer setup (matches DySample.__init__ / _init_pos)
# ------------------------------------------------------------------
def make_init_pos(scale, groups):
    s, G = scale, groups
    h = (jnp.arange(s, dtype=jnp.float32) - (s - 1) / 2.0) / s
    g0 = jnp.broadcast_to(h[None, :], (s, s))      # h[j]  (x component)
    g1 = jnp.broadcast_to(h[:, None], (s, s))      # h[i]  (y component)
    ip = jnp.stack([g0, g1])                       # [2, s, s]
    ip = jnp.tile(ip, (1, G, 1))                   # [2, G*s, s]
    return ip.reshape(-1)                          # [2*G*s*s]


# ------------------------------------------------------------------
# Forward pass
# ------------------------------------------------------------------
def dysample_forward(x, w_off, b_off, init_pos, *, scale, groups,
                     mxu_dtype=jnp.bfloat16, max_tile_lanes=None, force_hc=None):
    B, C, H, W = x.shape
    G, s = groups, scale
    Cg = C // G
    HW = H * W
    OH, OW = s * H, s * W
    OHW = OH * OW

    xf = x.astype(jnp.float32)

    # ---- offset head: 1x1 conv * 0.25 + init_pos (tiny; left to XLA, fuses with
    #      the elementwise + pixel-shuffle transpose) ----
    off = jnp.einsum('oc,bcp->bop', w_off.astype(jnp.float32), xf.reshape(B, C, HW))
    off = (off + b_off.astype(jnp.float32).reshape(1, -1, 1)) * 0.25 \
        + init_pos.astype(jnp.float32).reshape(1, -1, 1)
    off = off.reshape(B, 2, G, s, s, H, W)          # channels = (p, g, i, j)

    # Fold the low-res base coordinate into the offset (exact algebraic cancellation
    # of the +-0.5 / normalize / unnormalize terms of grid_sample, align_corners=False).
    sx = off[:, 0] + jnp.arange(W, dtype=jnp.float32)            # [B,G,s,s,H,W]
    sy = off[:, 1] + jnp.arange(H, dtype=jnp.float32)[:, None]   # [B,G,s,s,H,W]

    # Pixel-shuffle (i, j) sub-positions into output raster order; merge into one
    # (B, G, 2, OHW) coords tensor -> a single streamed per-tile DMA.
    sx = sx.transpose(0, 1, 4, 2, 5, 3).reshape(B, G, 1, OHW)
    sy = sy.transpose(0, 1, 4, 2, 5, 3).reshape(B, G, 1, OHW)
    coords = jnp.concatenate([sx, sy], axis=2)                   # (B, G, 2, OHW)

    # Grouped source, lane-dense over H*W, cast ONCE to the MXU dtype (halves DMA).
    x_grp = xf.reshape(B, G, Cg, HW).astype(mxu_dtype)

    separable = (W % 8 == 0)
    if force_hc is not None:
        assert H % force_hc == 0 and (force_hc == H or (force_hc * W) % 128 == 0)
    tile, ohw_pad, Hc, vmem_limit = _plan(
        OHW, H, W, Cg, jnp.dtype(mxu_dtype).itemsize, separable,
        max_tile_lanes=max_tile_lanes, force_hc=force_hc)

    if ohw_pad > OHW:   # pad to a multiple of the tile (lane-dense, unmasked stores)
        coords = jnp.pad(coords, ((0, 0), (0, 0), (0, 0), (0, ohw_pad - OHW)))

    out = grid_sample_call(x_grp, coords, B=B, G=G, Cg=Cg, H=H, W=W, Hc=Hc,
                           tile=tile, ohw_pad=ohw_pad, mxu_dtype=mxu_dtype,
                           separable=separable, vmem_limit=vmem_limit)
    if ohw_pad > OHW:
        out = out[..., :OHW]
    return out.reshape(B, C, OH, OW)


# ------------------------------------------------------------------
# Pure-JAX reference (no Pallas) for correctness checking
# ------------------------------------------------------------------
def dysample_ref(x, w_off, b_off, init_pos, *, scale, groups):
    B, C, H, W = x.shape
    G, s = groups, scale
    Cg = C // G
    conv = jnp.einsum('oc,bchw->bohw', w_off, x) + b_off[None, :, None, None]
    offset = conv * 0.25 + init_pos.reshape(1, -1, 1, 1)
    off = offset.reshape(B, 2, G, s, s, H, W)
    cx = jnp.broadcast_to((jnp.arange(W) + 0.5)[None, :], (H, W))
    cy = jnp.broadcast_to((jnp.arange(H) + 0.5)[:, None], (H, W))
    gx = 2 * (cx[None, None, None, None] + off[:, 0]) / W - 1
    gy = 2 * (cy[None, None, None, None] + off[:, 1]) / H - 1
    gx = gx.transpose(0, 1, 4, 2, 5, 3).reshape(B, G, s * H, s * W)
    gy = gy.transpose(0, 1, 4, 2, 5, 3).reshape(B, G, s * H, s * W)
    ix = jnp.clip(((gx + 1) * W - 1) / 2, 0, W - 1)
    iy = jnp.clip(((gy + 1) * H - 1) / 2, 0, H - 1)
    x0 = jnp.floor(ix); y0 = jnp.floor(iy)
    fx = ix - x0; fy = iy - y0
    x0i = x0.astype(jnp.int32); y0i = y0.astype(jnp.int32)
    x1i = jnp.minimum(x0i + 1, W - 1); y1i = jnp.minimum(y0i + 1, H - 1)
    xg = x.reshape(B, G, Cg, H, W)
    bi = jnp.arange(B)[:, None, None, None, None]
    gi = jnp.arange(G)[None, :, None, None, None]
    ci = jnp.arange(Cg)[None, None, :, None, None]

    def gather(yi, xi):
        return xg[bi, gi, ci, yi[:, :, None], xi[:, :, None]]

    v00 = gather(y0i, x0i); v01 = gather(y0i, x1i)
    v10 = gather(y1i, x0i); v11 = gather(y1i, x1i)
    fx_ = fx[:, :, None]; fy_ = fy[:, :, None]
    out = (v00 * (1 - fx_) * (1 - fy_) + v01 * fx_ * (1 - fy_)
           + v10 * (1 - fx_) * fy_ + v11 * fx_ * fy_)
    return out.reshape(B, C, s * H, s * W)


if __name__ == "__main__":
    key = jax.random.PRNGKey(0)
    kx, kw, kx2, kw2, kx3, kw3 = jax.random.split(key, 6)

    # ---- config 1: module defaults (groups=4, Cg=1) ----
    B, C, H, W = 2, 4, 16, 16
    scale, groups = 2, 4
    Cout = 2 * groups * scale * scale
    x = jax.random.normal(kx, (B, C, H, W), dtype=jnp.float32)
    w_off = 0.001 * jax.random.normal(kw, (Cout, C), dtype=jnp.float32)
    b_off = jnp.zeros((Cout,), dtype=jnp.float32)
    init_pos = make_init_pos(scale, groups)
    ref = dysample_ref(x, w_off, b_off, init_pos, scale=scale, groups=groups)

    # f32 MXU path (tight check): single-tile and forced 4-tile grids.
    for max_tile in (None, 256):
        out = dysample_forward(x, w_off, b_off, init_pos, scale=scale, groups=groups,
                               mxu_dtype=jnp.float32, max_tile_lanes=max_tile)
        out = jax.block_until_ready(out)
        assert out.shape == (B, C, scale * H, scale * W)
        err = float(jnp.max(jnp.abs(out - ref)))
        assert err < 1e-3, f"config1 f32 max abs error too large: {err} (tile={max_tile})"

    # Forced K-axis (HW-chunk) accumulation path, f32 (Hc=8 -> K=2).
    out = dysample_forward(x, w_off, b_off, init_pos, scale=scale, groups=groups,
                           mxu_dtype=jnp.float32, max_tile_lanes=256, force_hc=8)
    out = jax.block_until_ready(out)
    err = float(jnp.max(jnp.abs(out - ref)))
    assert err < 1e-3, f"config1 K-tiled max abs error too large: {err}"

    # Default bf16 MXU path (loose tolerance: weights/X rounded to bf16).
    out = dysample_forward(x, w_off, b_off, init_pos, scale=scale, groups=groups)
    out = jax.block_until_ready(out)
    err = float(jnp.max(jnp.abs(out - ref)))
    assert err < 5e-2, f"config1 bf16 max abs error too large: {err}"

    # ---- config 2: Cg > 1 path (groups=2, Cg=4), forced 2-tile grid, f32 ----
    B2, C2, H2, W2 = 1, 8, 16, 16
    scale2, groups2 = 2, 2
    Cout2 = 2 * groups2 * scale2 * scale2
    x2 = jax.random.normal(kx2, (B2, C2, H2, W2), dtype=jnp.float32)
    w_off2 = 0.001 * jax.random.normal(kw2, (Cout2, C2), dtype=jnp.float32)
    b_off2 = jnp.zeros((Cout2,), dtype=jnp.float32)
    init_pos2 = make_init_pos(scale2, groups2)
    ref2 = dysample_ref(x2, w_off2, b_off2, init_pos2, scale=scale2, groups=groups2)
    out2 = dysample_forward(x2, w_off2, b_off2, init_pos2, scale=scale2, groups=groups2,
                            mxu_dtype=jnp.float32, max_tile_lanes=512)
    out2 = jax.block_until_ready(out2)
    err2 = float(jnp.max(jnp.abs(out2 - ref2)))
    assert out2.shape == (B2, C2, scale2 * H2, scale2 * W2)
    assert err2 < 1e-3, f"config2 max abs error too large: {err2}"

    # ---- config 3: irregular spatial size (W % 8 != 0): fallback path + OHW padding ----
    B3, C3, H3, W3 = 1, 4, 10, 12
    scale3, groups3 = 2, 2
    Cout3 = 2 * groups3 * scale3 * scale3
    x3 = jax.random.normal(kx3, (B3, C3, H3, W3), dtype=jnp.float32)
    w_off3 = 0.001 * jax.random.normal(kw3, (Cout3, C3), dtype=jnp.float32)
    b_off3 = jnp.zeros((Cout3,), dtype=jnp.float32)
    init_pos3 = make_init_pos(scale3, groups3)
    ref3 = dysample_ref(x3, w_off3, b_off3, init_pos3, scale=scale3, groups=groups3)
    out3 = dysample_forward(x3, w_off3, b_off3, init_pos3, scale=scale3, groups=groups3,
                            mxu_dtype=jnp.float32)
    out3 = jax.block_until_ready(out3)
    err3 = float(jnp.max(jnp.abs(out3 - ref3)))
    assert out3.shape == (B3, C3, scale3 * H3, scale3 * W3)
    assert err3 < 1e-3, f"config3 max abs error too large: {err3}"

    print("KERNEL_OK")
</pallas_src>

<mosaic_0001>
module attributes {stable_mosaic.version = 11 : i64} {
  func.func @grid_sample_kernel(%arg0: i32, %arg1: i32, %arg2: i32, %arg3: i32, %arg4: memref<1x1x2x1024xf32, #tpu.memory_space<vmem>>, %arg5: memref<1x1x1x256xf32, #tpu.memory_space<vmem>>, %arg6: memref<1x1x1x1024xf32, #tpu.memory_space<vmem>>) attributes {dimension_semantics = [#tpu.dimension_semantics<parallel>, #tpu.dimension_semantics<parallel>, #tpu.dimension_semantics<arbitrary>, #tpu.dimension_semantics<arbitrary>], iteration_bounds = array<i64: 2, 4, 1, 1>, scalar_prefetch = 0 : i64, scratch_operands = 0 : i64, tpu.core_type = #tpu.core_type<tc>, window_params = [{transform_indices = @transform_0, window_bounds = array<i64: 1, 1, 2, 1024>}, {transform_indices = @transform_1, window_bounds = array<i64: 1, 1, 1, 256>}, {transform_indices = @transform_2, window_bounds = array<i64: 1, 1, 1, 1024>}]} {
    %c0 = arith.constant 0 : index
    %c0_0 = arith.constant 0 : index
    %c0_1 = arith.constant 0 : index
    %c0_2 = arith.constant 0 : index
    %0 = vector.load %arg4[%c0, %c0_0, %c0_1, %c0_2] : memref<1x1x2x1024xf32, #tpu.memory_space<vmem>>, vector<1x1x2x1024xf32>
    %1 = vector.shape_cast %0 : vector<1x1x2x1024xf32> to vector<2x1024xf32>
    %2 = vector.extract_strided_slice %1 {offsets = [0, 0], sizes = [1, 1024], strides = [1, 1]} : vector<2x1024xf32> to vector<1x1024xf32>
    %cst = arith.constant 0.000000e+00 : f32
    %cst_3 = arith.constant 1.500000e+01 : f32
    %3 = vector.broadcast %cst : f32 to vector<1x1024xf32>
    %4 = arith.maximumf %3, %2 : vector<1x1024xf32>
    %5 = vector.broadcast %cst_3 : f32 to vector<1x1024xf32>
    %6 = arith.minimumf %5, %4 : vector<1x1024xf32>
    %7 = vector.extract_strided_slice %1 {offsets = [1, 0], sizes = [1, 1024], strides = [1, 1]} : vector<2x1024xf32> to vector<1x1024xf32>
    %cst_4 = arith.constant 0.000000e+00 : f32
    %cst_5 = arith.constant 1.500000e+01 : f32
    %8 = vector.broadcast %cst_4 : f32 to vector<1x1024xf32>
    %9 = arith.maximumf %8, %7 : vector<1x1024xf32>
    %10 = vector.broadcast %cst_5 : f32 to vector<1x1024xf32>
    %11 = arith.minimumf %10, %9 : vector<1x1024xf32>
    %c16_i32 = arith.constant 16 : i32
    %12 = arith.muli %arg3, %c16_i32 : i32
    %13 = tpu.iota {dimensions = array<i32: 0>} : vector<16x1xi32>
    %14 = vector.broadcast %12 : i32 to vector<16x1xi32>
    %15 = arith.addi %13, %14 : vector<16x1xi32>
    %16 = arith.sitofp %15 : vector<16x1xi32> to vector<16x1xf32>
    %17 = tpu.iota {dimensions = array<i32: 0>} : vector<16x1xi32>
    %18 = arith.sitofp %17 : vector<16x1xi32> to vector<16x1xf32>
    %19 = vector.broadcast %16 : vector<16x1xf32> to vector<16x1024xf32>
    %20 = vector.broadcast %11 : vector<1x1024xf32> to vector<16x1024xf32>
    %21 = arith.subf %19, %20 : vector<16x1024xf32>
    %22 = math.absf %21 : vector<16x1024xf32>
    %cst_6 = arith.constant 1.000000e+00 : f32
    %23 = vector.broadcast %cst_6 : f32 to vector<16x1024xf32>
    %24 = arith.subf %23, %22 : vector<16x1024xf32>
    %cst_7 = arith.constant 0.000000e+00 : f32
    %25 = vector.broadcast %cst_7 : f32 to vector<16x1024xf32>
    %26 = arith.maximumf %25, %24 : vector<16x1024xf32>
    %27 = vector.broadcast %18 : vector<16x1xf32> to vector<16x1024xf32>
    %28 = vector.broadcast %6 : vector<1x1024xf32> to vector<16x1024xf32>
    %29 = arith.subf %27, %28 : vector<16x1024xf32>
    %30 = math.absf %29 : vector<16x1024xf32>
    %cst_8 = arith.constant 1.000000e+00 : f32
    %31 = vector.broadcast %cst_8 : f32 to vector<16x1024xf32>
    %32 = arith.subf %31, %30 : vector<16x1024xf32>
    %cst_9 = arith.constant 0.000000e+00 : f32
    %33 = vector.broadcast %cst_9 : f32 to vector<16x1024xf32>
    %34 = arith.maximumf %33, %32 : vector<16x1024xf32>
    %35 = vector.shape_cast %26 : vector<16x1024xf32> to vector<16x1x1024xf32>
    %36 = vector.shape_cast %34 : vector<16x1024xf32> to vector<1x16x1024xf32>
    %37 = vector.broadcast %35 : vector<16x1x1024xf32> to vector<16x16x1024xf32>
    %38 = vector.broadcast %36 : vector<1x16x1024xf32> to vector<16x16x1024xf32>
    %39 = arith.mulf %37, %38 : vector<16x16x1024xf32>
    %40 = vector.shape_cast %39 : vector<16x16x1024xf32> to vector<256x1024xf32>
    %c0_10 = arith.constant 0 : index
    %c0_11 = arith.constant 0 : index
    %c0_12 = arith.constant 0 : index
    %c0_13 = arith.constant 0 : index
    %41 = vector.load %arg5[%c0_10, %c0_11, %c0_12, %c0_13] : memref<1x1x1x256xf32, #tpu.memory_space<vmem>>, vector<1x1x1x256xf32>
    %42 = vector.shape_cast %41 : vector<1x1x1x256xf32> to vector<1x256xf32>
    %cst_14 = arith.constant dense<0.000000e+00> : vector<1x1024xf32>
    %43 = tpu.matmul %42, %40, %cst_14 {dimension_numbers = #tpu.dot_dimension_numbers<[1], [0], [0], [1], [0, 0, 1, 1], [], []>} : vector<1x256xf32>, vector<256x1024xf32>, vector<1x1024xf32> -> vector<1x1024xf32>
    %c0_15 = arith.constant 0 : index
    %c0_16 = arith.constant 0 : index
    %c0_17 = arith.constant 0 : index
    %c0_18 = arith.constant 0 : index
    %44 = vector.load %arg6[%c0_15, %c0_16, %c0_17, %c0_18] : memref<1x1x1x1024xf32, #tpu.memory_space<vmem>>, vector<1x1x1x1024xf32>
    %45 = vector.shape_cast %44 : vector<1x1x1x1024xf32> to vector<1x1024xf32>
    %46 = vector.shape_cast %43 : vector<1x1024xf32> to vector<1x1x1x1024xf32>
    tpu.vector_store %arg6[%c0_15, %c0_16, %c0_17, %c0_18], %46 {strides = array<i32>} : memref<1x1x1x1024xf32, #tpu.memory_space<vmem>>, vector<1x1x1x1024xf32>,
    return
  }
  func.func @transform_0(%arg0: i32, %arg1: i32, %arg2: i32, %arg3: i32) -> (i32, i32, i32, i32) {
    %c0_i32 = arith.constant 0 : i32
    %c0_i32_0 = arith.constant 0 : i32
    return %arg0, %arg1, %c0_i32, %arg2 : i32, i32, i32, i32
  }
  func.func @transform_1(%arg0: i32, %arg1: i32, %arg2: i32, %arg3: i32) -> (i32, i32, i32, i32) {
    %c0_i32 = arith.constant 0 : i32
    %c0_i32_0 = arith.constant 0 : i32
    return %arg0, %arg1, %c0_i32, %arg3 : i32, i32, i32, i32
  }
  func.func @transform_2(%arg0: i32, %arg1: i32, %arg2: i32, %arg3: i32) -> (i32, i32, i32, i32) {
    %c0_i32 = arith.constant 0 : i32
    %c0_i32_0 = arith.constant 0 : i32
    return %arg0, %arg1, %c0_i32, %arg2 : i32, i32, i32, i32
  }
}

</mosaic_0001>

<bundles_post_ra>
// kernel: tpu_custom_call.1
= control target key start
LH: loop header
LB: loop body
LE: loop exit
PB: predicated region body
PF: predicated region fallthrough
CT: control target
= control target key end

     0   :  { %s3639_s0 = inlined_call_operand.hbm [shape: f32[2,4,2,1024], index: 0, kind: input, shape index: {}]   ;;  %s3640_s1 = inlined_call_operand.hbm [shape: f32[2,4,1,256], index: 1, kind: input, shape index: {}]   ;;  %s3641_s2 = inlined_call_operand.hbm [shape: f32[2,4,1,1024], index: 2, kind: output, shape index: {}]  }
   0x1   :  { %3653 = sst [smem:[#allocation18_spill]] %s3639_s0 }
   0x2   :  { %7 = vsyncpa [#allocation3], 0 }
   0x3   :  { %9 = vsyncpa [#allocation3 + $0x1], 0 }
   0x4   :  { %10 = vsyncpa [#allocation6], 0 }
   0x5   :  { %12 = vsyncpa [#allocation6 + $0x1], 0 }
   0x6   :  { %13 = vsyncpa [#allocation4], 0 }
   0x7   :  { %15 = vsyncpa [#allocation4 + $0x1], 0  ;;  %s2504_s9 = smov 0   ;;  %s2506_s10 = smov 0  }
   0x8   :  { %s2508_s11 = smov 0   ;;  %s2510_s12 = smov 0  }
   0x9   :  { %s2512_s13 = smov 0   ;;  %s2514_s14 = smov 0  }
   0xa   :  { %s2516_s15 = smov 0   ;;  %s2518_s16 = smov 0  }
   0xb LB: > { %3654 = sst [smem:[#allocation11_spill]] %s2479_s15  ;;  %s2221_s17 = sadd.s32 4294967295, %s2483_s16   ;;  %s2483_s16 = sphi %s2518_s16, %s21_s16   ;;  %s2479_s15 = sphi %s2516_s15, %s3687_s15   ;;  %s2475_s14 = sphi %s2514_s14, %s3692_s14   ;;  %s2471_s13 = sphi %s2512_s13, %s3685_s13   ;;  %s2467_s12 = sphi %s2510_s12, %s3691_s12   ;;  %s2463_s11 = sphi %s2508_s11, %s3690_s11   ;;  %s2459_s10 = sphi %s2506_s10, %s3689_s10   ;;  %s2455_s9 = sphi %s2504_s9, %s3688_s9  }
   0xc   : > { %s2222_s18 = sadd.s32 4294967294, %s2483_s16   ;;  %s43_s19 = sadd.s32 1, %s2475_s14 }
   0xd   : > { %s47_s20 = sadd.s32 1, %s2479_s15  ;;  %p45_p0 = scmp.ge.s32.totalorder %s43_s19, 4 }
   0xe   : > { %s58_s21 = sadd.s32 1, %s2463_s11  ;;  %p65_p1 = scmp.ne.s32.totalorder %s2463_s11, %s2459_s10 }
   0xf   : > { %p66_p2 = scmp.eq.s32.totalorder %s2483_s16, 0  ;;  %s3694_s19 = smov (%p45_p0, %s43_s19), 0 }
  0x10   : > { %3655 = sst [smem:[#allocation12_spill]] %s3694_s19  ;;  %s3696_s20 = smov (!%p45_p0, %s47_s20), %s2479_s15 }
  0x11   : > { %s52_s22 = ssub.s32 %s2475_s14, %s3694_s19  ;;  %p2557_p3 = por %p66_p2, %p65_p1 }
  0x12   : > { %p49_p4 = scmp.ge.s32.totalorder %s3696_s20, 2  ;;  %p71_p5 = scmp.ne.s32.totalorder %s2459_s10, %s2455_s9 }
  0x13   : > { %p72_p6 = scmp.eq.s32.totalorder %s2221_s17, 0  ;;  %p129_p7 = scmp.eq.s32.totalorder %s2221_s17, 7 }
  0x14   : > { %s3698_s20 = smov (%p49_p4, %s3696_s20), 0  ;;  %p135_p10 = scmp.eq.s32.totalorder %s2222_s18, 7 }
  0x15   : > { %3657 = sst [smem:[#allocation13_spill]] %s3698_s20  ;;  %p2565_p8 = por %p72_p6, %p71_p5 }
  0x16   : > { %p2569_p9 = por %p129_p7, %p65_p1  ;;  %s51_s26 = ssub.s32 %s2479_s15, %s3698_s20 }
  0x17   : > { %s53_s27 = sor.u32 %s52_s22, %s51_s26  ;;  %p2575_p12 = por %p135_p10, %p71_p5 }
  0x18   : > { %p56_p11 = scmp.eq.s32.totalorder %s53_s27, 0  ;;  %p2260_p13 = scmp.lt.s32.totalorder %s2483_s16, 8 }
  0x19   : > { %s2581_s29 = sand.u32 1, %s2463_s11   ;;  %s2226_s4 = sshll.u32 %s2475_s14, 3 }
  0x1a   : > { %s2584_s30 = scalar_select %p56_p11, %s2463_s11, %s58_s21  }
  0x1b   : > { %s2225_s3 = sshll.u32 %s2581_s29, 4  ;;  %s2227_s5 = sshll.u32 %s2479_s15, 5 }
  0x1c   : > { %s159_s6 = scalar_lea.vmem [#allocation2], %s2225_s3  ;;  %s167_s8 = sadd.s32 %s2227_s5, %s2226_s4 }
  0x1d   : > { %s171_s7 = sshll.u32 %s159_s6, 4  ;;  %s2228_s17 = sshll.u32 %s167_s8, 5  ;;  %s172_s7 = int_to_ptr.vmem [resolvable:$true] %s171_s7 }
  0x1e   : > { %p2591_p0 = pnand %p2260_p13, %p2557_p3  ;;  %s3662_s0 = sld [smem:[#allocation18_spill]] }
  0x1f   : > { %p2233_p1 = scmp.ge.s32.totalorder %s2483_s16, 1  ;;  %p199_p2 = scmp.lt.s32.totalorder %s2483_s16, 9 }
  0x20   : > { %s156_s27 = scalar_lea.sflag [#allocation3], %s2581_s29  ;;  %p2329_p4 = pneg %p2591_p0 }
  0x21   : > { %s2340_s3 = scalar_lea.vmem %s172_s7, 256  ;;  %s2485_s23 = smov [#allocation2]  }
  0x22   : > { %p2341_p5 = scmp.ne.s32.totalorder %s172_s7, %s2340_s3  ;;  %s2345_s4 = sshll.u32 %s2485_s23, 4  ;;  %s2346_s4 = int_to_ptr.vmem [resolvable:$false] %s2345_s4 }
  0x23   : > { %s2347_s5 = scalar_lea.vmem %s2346_s4, 512  ;;  %p2348_p7 = scmp.lt.s32.totalorder %s172_s7, %s2346_s4 }
  0x24   : > { %s169_s21 = scalar_lea.hbm %s3662_s0, %s2228_s17  ;;  %p2343_p6 = pnand %p2341_p5, %p2329_p4 }
  0x25   : > { %p2349_p10 = scmp.lt.s32.totalorder %s2347_s5, %s2340_s3 }
  0x26   : > { %p2344_p3 = pneg %p2343_p6 }
  0x27   : > { %p2350_p11 = por %p2349_p10, %p2348_p7 }
  0x29   : > { %p2351_p13 = pnand %p2350_p11, %p2344_p3 }
  0x2b   : > { %2354 = shalt.err (!%p2351_p13)
}
  0x2c   : > { %2252 = dma.hbm_to_vmem [thread:$0]  (!%p2591_p0), %s169_s21, 256, %s172_s7, %s156_s27  }
  0x2d   : > { %p2612_p5 = pnand %p2233_p1, %p199_p2  ;;  %s2229_s8 = sshll.u32 %s2581_s29, 1 }
  0x2e   : > { %s2230_s17 = sshll.u32 %s2475_s14, 1  ;;  %s2231_s22 = sshll.u32 %s2479_s15, 3 }
  0x2f   : > { %s190_s26 = sadd.s32 %s2231_s22, %s2230_s17  ;;  %s182_s3 = scalar_lea.vmem [#allocation5], %s2229_s8 }
  0x30   : > { %s194_s23 = sshll.u32 %s182_s3, 4  ;;  %s2232_s4 = sshll.u32 %s190_s26, 4  ;;  %s195_s23 = int_to_ptr.vmem [resolvable:$true] %s194_s23 }
  0x31   : > { %s192_s20 = scalar_lea.hbm %s3640_s1, %s2232_s4  ;;  %s179_s19 = scalar_lea.sflag [#allocation6], %s2581_s29 }
  0x32   : > { %s2368_s7 = scalar_lea.vmem %s195_s23, 32  ;;  %s2486_s21 = smov [#allocation5]  }
  0x33   : > { %p2369_p6 = scmp.ne.s32.totalorder %s195_s23, %s2368_s7  ;;  %s2373_s27 = sshll.u32 %s2486_s21, 4  ;;  %s2374_s27 = int_to_ptr.vmem [resolvable:$false] %s2373_s27 }
  0x34   : > { %s2375_s15 = scalar_lea.vmem %s2374_s27, 64  ;;  %p2376_p3 = scmp.lt.s32.totalorder %s195_s23, %s2374_s27 }
  0x35   : > { %p2371_p1 = pnand %p2369_p6, %p2329_p4  ;;  %p2377_p7 = scmp.lt.s32.totalorder %s2375_s15, %s2368_s7 }
  0x37   : > { %p2372_p2 = pneg %p2371_p1  ;;  %p2378_p10 = por %p2377_p7, %p2376_p3 }
  0x39   : > { %p2379_p11 = pnand %p2378_p10, %p2372_p2 }
  0x3b   : > { %2382 = shalt.err (!%p2379_p11)
}
  0x3c   : > { %2255 = dma.hbm_to_vmem [thread:$0]  (!%p2591_p0), %s192_s20, 32, %s195_s23, %s179_s19  }
  0x3d   : > { %203 = sbr.rel (%p2612_p5) target bundleno = 483 (0x1e3), region = 28 }
  0x42   : > { %s2631_s0 = sand.u32 1, %s2459_s10  }
  0x43   : > { %s2234_s29 = sshll.u32 %s2631_s0, 4  ;;  %s206_s8 = scalar_lea.sflag [#allocation3], %s2631_s0 }
  0x44   : > { %s209_s17 = scalar_lea.vmem [#allocation2], %s2234_s29 }
  0x45   : > { %2442 = dma.done.wait (%p2565_p8), %s206_s8, 256  }
  0x46   : > { %2444 = vsyncadd (%p2565_p8), %s206_s8, 4294967040  ;;  %s2235_s15 = sshll.u32 %s2631_s0, 1  ;;  %s215_s19 = scalar_lea.sflag [#allocation6], %s2631_s0 }
  0x47   : > { %s218_s20 = scalar_lea.vmem [#allocation5], %s2235_s15 }
  0x48   : > { %2446 = dma.done.wait (%p2565_p8), %s215_s19, 32  }
  0x49   : > { %2448 = vsyncadd (%p2565_p8), %s215_s19, 4294967264  ;;  %v254_v0 = vlaneseq  ;;  %v247_v4 = vld [vmem:[%s209_s17] sm:$0xff]  ;;  %v248_v5 = vld [vmem:[%s209_s17 + $0x8] sm:$0xff]  ;;  %v2487_v50 = vmov 1966171168   ;;  %s2236_s24 = sshll.u32 %s2631_s0, 3 }
  0x4a   : > { %v2659_v8 = vld [vmem:[%s218_s20] sm:$0x3]  ;;  %v249_v9 = vmax.f32 %v247_v4, 0.0  ;;  %v250_v10 = vmax.f32 %v248_v5, 0.0  ;;  %v563_v51 = vunpack.c.l.s4 %v2487_v50  ;;  %s2238_s18 = sshll.u32 %s2467_s12, 3  ;;  %s2239_s6 = sshll.u32 %s2471_s13, 5 }
  0x4b   : > { %v2645_v1 = vshrl.u32 %v254_v0, 7  ;;  %s2092_s22 = sadd.s32 %s2239_s6, %s2238_s18  ;;  %s243_s3 = scalar_lea.vmem [#allocation7], %s2236_s24 }
  0x4c   : > { %v2668_v13 = vmin.f32 %v249_v9, 15.0  ;;  %v2673_v15 = vmin.f32 %v250_v10, 15.0  ;;  %v564_v60 = vunpack.c.0.s8 %v563_v51  ;;  %s2240_s26 = sshll.u32 %s2092_s22, 4  ;;  %s2096_s23 = sshll.u32 %s243_s3, 4  ;;  %s2097_s23 = int_to_ptr.vmem [resolvable:$true] %s2096_s23 }
  0x4d   : > { %v2648_v2 = vsub.s32 1, %v2645_v1  ;;  %v2651_v3 = vsub.s32 0, %v2645_v1  ;;  %v2654_v6 = vsub.s32 2, %v2645_v1  ;;  %v2657_v7 = vsub.s32 4, %v2645_v1  ;;  %s2094_s4 = scalar_lea.hbm %s3641_s2, %s2240_s26  ;;  %s2078_s5 = scalar_lea.sflag [#allocation4], %s2631_s0 }
  0x4e   : > { %v2662_v11 = vsub.s32 6, %v2645_v1  ;;  %v256_v14 = vadd.s32 8, %v2645_v1  ;;  %v2692_v24 = vcvt.s32.f32 %v2645_v1  ;;  %v2737_v61 = vsub.s32 3, %v2645_v1  ;;  %s2383_s7 = scalar_lea.vmem %s2097_s23, 128  ;;  %s2488_s21 = smov [#allocation7]  }
  0x4f   : > { %v2666_v12 = vrot.slane %v2659_v8, %v2648_v2  ;;  %v405_v16 = vrot.slane %v2668_v13, %v2651_v3  ;;  %v409_v17 = vrot.slane %v2668_v13, %v2654_v6  ;;  %v413_v18 = vrot.slane %v2668_v13, %v2657_v7  ;;  %p2384_p8 = scmp.ne.s32.totalorder %s2097_s23, %s2383_s7  ;;  %s2387_s27 = sshll.u32 %s2488_s21, 4  ;;  %s2388_s27 = int_to_ptr.vmem [resolvable:$false] %s2387_s27 }
  0x50   : > { %v417_v19 = vrot.slane %v2668_v13, %v2662_v11  ;;  %v421_v20 = vrot.slane %v2673_v15, %v2651_v3  ;;  %v425_v21 = vrot.slane %v2673_v15, %v2654_v6  ;;  %v429_v22 = vrot.slane %v2673_v15, %v2657_v7  ;;  %s2389_s29 = scalar_lea.vmem %s2388_s27, 256  ;;  %p2390_p13 = scmp.lt.s32.totalorder %s2097_s23, %s2388_s27 }
  0x51   : > { %3664 = vst [vmem:[#allocation14_spill] sm:$0xff] %v2666_v12  ;;  %1798 = vmatprep.mubr.f32.mxu0 %v2666_v12  ;;  %1869 = vmatprep.mubr.f32.mxu1 %v2666_v12  ;;  %v433_v23 = vrot.slane %v2673_v15, %v2662_v11  ;;  %v2694_v25 = vcvt.s32.f32 %v256_v14  ;;  %v445_v30 = vrot.slane %v405_v16, %v2651_v3  ;;  %v2740_v62 = vsub.s32 5, %v2645_v1  ;;  %p2385_p0 = pnand %p2384_p8, %p2569_p9  ;;  %p2391_p5 = scmp.lt.s32.totalorder %s2389_s29, %s2383_s7 }
  0x52   : > { %v2697_v26 = vrot.slane %v421_v20, %v2651_v3  ;;  %v2700_v27 = vrot.slane %v425_v21, %v2651_v3  ;;  %v2703_v28 = vrot.slane %v429_v22, %v2651_v3  ;;  %v449_v31 = vrot.slane %v409_v17, %v2651_v3 }
  0x53   : > { %v2706_v29 = vrot.slane %v433_v23, %v2651_v3  ;;  %v453_v32 = vrot.slane %v413_v18, %v2651_v3  ;;  %v457_v33 = vrot.slane %v417_v19, %v2651_v3  ;;  %v474_v38 = vsub.f32 %v2692_v24, %v445_v30  ;;  %p2386_p4 = pneg %p2385_p0  ;;  %p2392_p6 = por %p2391_p5, %p2390_p13 }
  0x54   : > { %v475_v39 = vsub.f32 %v2692_v24, %v449_v31  ;;  %v487_v43 = vsub.f32 %v2694_v25, %v2700_v27  ;;  %v482_v46 = vsub.f32 %v2694_v25, %v445_v30  ;;  %v483_v47 = vsub.f32 %v2694_v25, %v449_v31 }
  0x55   : > { %v476_v40 = vsub.f32 %v2692_v24, %v453_v32  ;;  %v477_v41 = vsub.f32 %v2692_v24, %v457_v33  ;;  %v484_v48 = vsub.f32 %v2694_v25, %v453_v32  ;;  %v485_v49 = vsub.f32 %v2694_v25, %v457_v33  ;;  %p2393_p1 = pnand %p2392_p6, %p2386_p4 }
  0x56   : > { %v490_v52 = vand.u32 2147483647, %v474_v38  ;;  %v491_v53 = vand.u32 2147483647, %v475_v39  ;;  %v498_v56 = vand.u32 2147483647, %v482_v46  ;;  %v2746_v18 = vsub.s32 %v564_v60, %v2645_v1 }
  0x57   : > { %v492_v54 = vand.u32 2147483647, %v476_v40  ;;  %v493_v55 = vand.u32 2147483647, %v477_v41  ;;  %v499_v57 = vand.u32 2147483647, %v483_v47  ;;  %v269_v19 = vrot.slane %v2668_v13, %v2648_v2 }
  0x58   : > { %v500_v58 = vand.u32 2147483647, %v484_v48  ;;  %v501_v59 = vand.u32 2147483647, %v485_v49  ;;  %v2743_v63 = vsub.s32 7, %v2645_v1  ;;  %v506_v0 = vsub.f32 1.0, %v490_v52 }
  0x59   : > { %v507_v4 = vsub.f32 1.0, %v491_v53  ;;  %v508_v5 = vsub.f32 1.0, %v492_v54  ;;  %v509_v9 = vsub.f32 1.0, %v493_v55  ;;  %v514_v10 = vsub.f32 1.0, %v498_v56 }
  0x5a   : > { %v515_v14 = vsub.f32 1.0, %v499_v57  ;;  %v516_v16 = vsub.f32 1.0, %v500_v58  ;;  %v517_v17 = vsub.f32 1.0, %v501_v59  ;;  %v2752_v20 = vrot.slane %v2659_v8, %v2651_v3 }
  0x5b   : > { %v2754_v21 = vand.u32 2147483647, %v487_v43  ;;  %v273_v22 = vrot.slane %v2668_v13, %v2737_v61  ;;  %v277_v23 = vrot.slane %v2668_v13, %v2740_v62  ;;  %v281_v30 = vrot.slane %v2668_v13, %v2743_v63 }
  0x5c   : > { %v2762_v1 = vmax.f32 %v506_v0, 0.0  ;;  %v2764_v31 = vmax.f32 %v507_v4, 0.0  ;;  %v2766_v32 = vmax.f32 %v508_v5, 0.0  ;;  %v285_v8 = vrot.slane %v2673_v15, %v2648_v2 }
  0x5d   : > { %v2770_v33 = vmax.f32 %v509_v9, 0.0  ;;  %v2772_v38 = vmax.f32 %v514_v10, 0.0  ;;  %v2774_v39 = vmax.f32 %v515_v14, 0.0  ;;  %v2776_v40 = vmax.f32 %v516_v16, 0.0 }
  0x5e   : > { %v2778_v41 = vmax.f32 %v517_v17, 0.0  ;;  %v289_v13 = vrot.slane %v2673_v15, %v2737_v61  ;;  %v293_v43 = vrot.slane %v2673_v15, %v2740_v62  ;;  %v297_v46 = vrot.slane %v2673_v15, %v2743_v63 }
  0x5f   : > { %v2787_v47 = vrot.slane %v269_v19, %v2648_v2  ;;  %v2790_v48 = vrot.slane %v273_v22, %v2648_v2  ;;  %v2793_v49 = vrot.slane %v277_v23, %v2648_v2  ;;  %v2796_v50 = vrot.slane %v281_v30, %v2648_v2 }
  0x60   : > { %v2799_v51 = vrot.slane %v285_v8, %v2648_v2  ;;  %v2802_v52 = vrot.slane %v289_v13, %v2648_v2  ;;  %v2805_v15 = vrot.slane %v293_v43, %v2648_v2  ;;  %v2808_v53 = vrot.slane %v297_v46, %v2648_v2 }
  0x61   : > { %v338_v54 = vsub.f32 %v2692_v24, %v2787_v47  ;;  %v339_v55 = vsub.f32 %v2692_v24, %v2790_v48  ;;  %v340_v56 = vsub.f32 %v2692_v24, %v2793_v49  ;;  %v341_v57 = vsub.f32 %v2692_v24, %v2796_v50 }
  0x62   : > { %v342_v58 = vsub.f32 %v2692_v24, %v2799_v51  ;;  %v343_v59 = vsub.f32 %v2692_v24, %v2802_v52  ;;  %v344_v60 = vsub.f32 %v2692_v24, %v2805_v15  ;;  %v345_v0 = vsub.f32 %v2692_v24, %v2808_v53 }
  0x63   : > { %v354_v4 = vand.u32 2147483647, %v338_v54  ;;  %v355_v5 = vand.u32 2147483647, %v339_v55  ;;  %v356_v9 = vand.u32 2147483647, %v340_v56  ;;  %v346_v10 = vsub.f32 %v2694_v25, %v2787_v47 }
  0x64   : > { %v357_v14 = vand.u32 2147483647, %v341_v57  ;;  %v358_v16 = vand.u32 2147483647, %v342_v58  ;;  %v359_v17 = vand.u32 2147483647, %v343_v59  ;;  %v347_v19 = vsub.f32 %v2694_v25, %v2790_v48 }
  0x65   : > { %v360_v22 = vand.u32 2147483647, %v344_v60  ;;  %v361_v23 = vand.u32 2147483647, %v345_v0  ;;  %v370_v30 = vsub.f32 1.0, %v354_v4  ;;  %v371_v8 = vsub.f32 1.0, %v355_v5 }
  0x66   : > { %v372_v13 = vsub.f32 1.0, %v356_v9  ;;  %v373_v43 = vsub.f32 1.0, %v357_v14  ;;  %v374_v46 = vsub.f32 1.0, %v358_v16  ;;  %v375_v45 = vsub.f32 1.0, %v359_v17 }
  0x67   : > { %v376_v54 = vsub.f32 1.0, %v360_v22  ;;  %v377_v55 = vsub.f32 1.0, %v361_v23  ;;  %v386_v56 = vmax.f32 %v370_v30, 0.0  ;;  %v387_v44 = vmax.f32 %v371_v8, 0.0 }
  0x68   : > { %v388_v42 = vmax.f32 %v372_v13, 0.0  ;;  %v389_v37 = vmax.f32 %v373_v43, 0.0  ;;  %v390_v57 = vmax.f32 %v374_v46, 0.0  ;;  %v391_v58 = vmax.f32 %v375_v45, 0.0 }
  0x69   : > { %v392_v59 = vmax.f32 %v376_v54, 0.0  ;;  %v393_v36 = vmax.f32 %v377_v55, 0.0  ;;  %v555_v35 = vcombine.high %v386_v56, %v387_v44  ;;  %v554_v34 = vcombine.low %v386_v56, %v387_v44 }
  0x6a   : > { %v557_v60 = vcombine.high %v388_v42, %v389_v37  ;;  %v559_v0 = vcombine.high %v390_v57, %v391_v58  ;;  %v556_v4 = vcombine.low %v388_v42, %v389_v37  ;;  %v558_v5 = vcombine.low %v390_v57, %v391_v58 }
  0x6b   : > { %v561_v9 = vcombine.high %v392_v59, %v393_v36  ;;  %v575_v14 = vrot.slane %v555_v35, %v2746_v18  ;;  %v560_v16 = vcombine.low %v392_v59, %v393_v36  ;;  %v568_v17 = vrot.slane %v554_v34, %v2746_v18 }
  0x6c   : > { %v589_v22 = vrot.slane %v557_v60, %v2746_v18  ;;  %v603_v23 = vrot.slane %v559_v0, %v2746_v18  ;;  %v582_v45 = vrot.slane %v556_v4, %v2746_v18  ;;  %v596_v30 = vrot.slane %v558_v5, %v2746_v18 }
  0x6d   : > { %v617_v44 = vrot.slane %v561_v9, %v2746_v18  ;;  %v610_v8 = vrot.slane %v560_v16, %v2746_v18  ;;  %v350_v9 = vsub.f32 %v2694_v25, %v2799_v51  ;;  %v2904_v37 = vand.u32 2147483647, %v346_v10 }
  0x6e   : > { %v621_v36 = vcombine.high %v575_v14, %v589_v22  ;;  %v620_v34 = vcombine.low %v575_v14, %v589_v22  ;;  %v619_v42 = vcombine.high %v568_v17, %v582_v45  ;;  %v618_v13 = vcombine.low %v568_v17, %v582_v45 }
  0x6f   : > { %v625_v43 = vcombine.high %v603_v23, %v617_v44  ;;  %v624_v46 = vcombine.low %v603_v23, %v617_v44  ;;  %v623_v54 = vcombine.high %v596_v30, %v610_v8  ;;  %v622_v55 = vcombine.low %v596_v30, %v610_v8 }
  0x70   : > { %v653_v56 = vrot.slane %v621_v36, %v2746_v18  ;;  %v639_v57 = vrot.slane %v620_v34, %v2746_v18  ;;  %v646_v58 = vrot.slane %v619_v42, %v2746_v18  ;;  %v632_v59 = vrot.slane %v618_v13, %v2746_v18 }
  0x71   : > { %v681_v60 = vrot.slane %v625_v43, %v2746_v18  ;;  %v667_v0 = vrot.slane %v624_v46, %v2746_v18  ;;  %v674_v4 = vrot.slane %v623_v54, %v2746_v18  ;;  %v660_v5 = vrot.slane %v622_v55, %v2746_v18 }
  0x72   : > { %v351_v14 = vsub.f32 %v2694_v25, %v2802_v52 }
  0x73   : > { %v2858_v22 = vcombine.high %v653_v56, %v681_v60  ;;  %v2860_v23 = vcombine.high %v639_v57, %v667_v0  ;;  %v2862_v45 = vcombine.low %v653_v56, %v681_v60  ;;  %v2864_v30 = vcombine.low %v639_v57, %v667_v0 }
  0x74   : > { %v2866_v44 = vcombine.high %v646_v58, %v674_v4  ;;  %v2868_v51 = vcombine.high %v632_v59, %v660_v5  ;;  %v2870_v8 = vcombine.low %v646_v58, %v674_v4  ;;  %v2872_v52 = vcombine.low %v632_v59, %v660_v5 }
  0x75   : > { %v1057_v36 = vrot.slane %v2858_v22, %v2648_v2  ;;  %v1065_v34 = vrot.slane %v2858_v22, %v2737_v61  ;;  %v1053_v42 = vrot.slane %v2858_v22, %v2651_v3  ;;  %v1061_v13 = vrot.slane %v2858_v22, %v2654_v6 }
  0x76   : > { %v1025_v43 = vrot.slane %v2860_v23, %v2648_v2  ;;  %v1033_v46 = vrot.slane %v2860_v23, %v2737_v61  ;;  %v1021_v54 = vrot.slane %v2860_v23, %v2651_v3  ;;  %v1029_v55 = vrot.slane %v2860_v23, %v2654_v6 }
  0x77   : > { %v1587_v56 = vmul.f32 %v1057_v36, %v2774_v39  ;;  %v1589_v57 = vmul.f32 %v1065_v34, %v2778_v41  ;;  %v1586_v58 = vmul.f32 %v1053_v42, %v2772_v38  ;;  %v1588_v59 = vmul.f32 %v1061_v13, %v2776_v40 }
  0x78   : > { %v1579_v60 = vmul.f32 %v1057_v36, %v2764_v31  ;;  %v1581_v0 = vmul.f32 %v1065_v34, %v2770_v33  ;;  %v1578_v4 = vmul.f32 %v1053_v42, %v2762_v1  ;;  %v1580_v5 = vmul.f32 %v1061_v13, %v2766_v32 }
  0x79   : > { %1734 = vmatprep.subr.mxu0 %v1587_v56  ;;  %1805 = vmatprep.subr.mxu1 %v1589_v57  ;;  %v1571_v17 = vmul.f32 %v1025_v43, %v2774_v39  ;;  %v1573_v16 = vmul.f32 %v1033_v46, %v2778_v41  ;;  %v1570_v35 = vmul.f32 %v1021_v54, %v2772_v38  ;;  %v2912_v13 = vand.u32 2147483647, %v347_v19 }
  0x7a   : > { %1735 = vmatpush1.msra.mxu0 %v1586_v58  ;;  %1806 = vmatpush1.msra.mxu1 %v1588_v59  ;;  %v1572_v36 = vmul.f32 %v1029_v55, %v2776_v40  ;;  %v1563_v34 = vmul.f32 %v1025_v43, %v2764_v31  ;;  %v1565_v42 = vmul.f32 %v1033_v46, %v2770_v33 }
  0x7b   : > { %1736 = vmatprep.subr.mxu0 %v1579_v60  ;;  %1807 = vmatprep.subr.mxu1 %v1581_v0  ;;  %v1562_v56 = vmul.f32 %v1021_v54, %v2762_v1  ;;  %v1564_v47 = vmul.f32 %v1029_v55, %v2766_v32  ;;  %v993_v10 = vrot.slane %v2862_v45, %v2648_v2  ;;  %v2938_v60 = vand.u32 2147483647, %v350_v9 }
  0x7c   : > { %v3665_v57 = vsub.f32 %v2694_v25, %v2793_v49  ;;  %1737 = vmatpush1.msra.mxu0 %v1578_v4  ;;  %1808 = vmatpush1.msra.mxu1 %v1580_v5  ;;  %v1001_v48 = vrot.slane %v2862_v45, %v2737_v61  ;;  %v989_v19 = vrot.slane %v2862_v45, %v2651_v3  ;;  %v2943_v5 = vand.u32 2147483647, %v351_v14 }
  0x7d   : > { %v997_v46 = vrot.slane %v2862_v45, %v2654_v6  ;;  %v3666_v54 = vsub.f32 %v2694_v25, %v2796_v50  ;;  %1738 = vmatprep.subr.mxu0 %v1571_v17  ;;  %1809 = vmatprep.subr.mxu1 %v1573_v16  ;;  %v1555_v49 = vmul.f32 %v993_v10, %v2774_v39 }
  0x7e   : > { %v2921_v43 = vand.u32 2147483647, %v3665_v57  ;;  %v1547_v58 = vmul.f32 %v993_v10, %v2764_v31  ;;  %v961_v59 = vrot.slane %v2864_v30, %v2648_v2  ;;  %1739 = vmatpush1.msra.mxu0 %v1570_v35  ;;  %1810 = vmatpush1.msra.mxu1 %v1572_v36  ;;  %v1557_v0 = vmul.f32 %v1001_v48, %v2778_v41 }
  0x7f   : > { %v2932_v55 = vand.u32 2147483647, %v3666_v54  ;;  %v1554_v4 = vmul.f32 %v989_v19, %v2772_v38  ;;  %v1556_v50 = vmul.f32 %v997_v46, %v2776_v40  ;;  %1740 = vmatprep.subr.mxu0 %v1563_v34  ;;  %1811 = vmatprep.subr.mxu1 %v1565_v42  ;;  %v1549_v16 = vmul.f32 %v1001_v48, %v2770_v33 }
  0x80   : > { %v1546_v17 = vmul.f32 %v989_v19, %v2762_v1  ;;  %v1548_v10 = vmul.f32 %v997_v46, %v2766_v32  ;;  %v3667_v35 = vsub.f32 %v2694_v25, %v2805_v15  ;;  %1741 = vmatpush1.msra.mxu0 %v1562_v56  ;;  %1812 = vmatpush1.msra.mxu1 %v1564_v47  ;;  %v378_v48 = vsub.f32 1.0, %v2904_v37 }
  0x81   : > { %v1539_v36 = vmul.f32 %v961_v59, %v2774_v39  ;;  %v969_v14 = vrot.slane %v2864_v30, %v2737_v61  ;;  %v957_v34 = vrot.slane %v2864_v30, %v2651_v3  ;;  %v3668_v42 = vsub.f32 %v2694_v25, %v2808_v53  ;;  %1742 = vmatprep.subr.mxu0 %v1555_v49 }
  0x82   : > { %v2951_v9 = vand.u32 2147483647, %v3667_v35  ;;  %1813 = vmatprep.subr.mxu1 %v1557_v0  ;;  %v965_v15 = vrot.slane %v2864_v30, %v2654_v6  ;;  %v1531_v56 = vmul.f32 %v961_v59, %v2764_v31  ;;  %v929_v47 = vrot.slane %v2866_v44, %v2648_v2  ;;  %1743 = vmatpush1.msra.mxu0 %v1554_v4 }
  0x83   : > { %v2961_v57 = vand.u32 2147483647, %v3668_v42  ;;  %1814 = vmatpush1.msra.mxu1 %v1556_v50  ;;  %v1541_v19 = vmul.f32 %v969_v14, %v2778_v41  ;;  %v1538_v53 = vmul.f32 %v957_v34, %v2772_v38  ;;  %v1533_v46 = vmul.f32 %v969_v14, %v2770_v33  ;;  %1744 = vmatprep.subr.mxu0 %v1547_v58 }
  0x84   : > { %v379_v54 = vsub.f32 1.0, %v2912_v13  ;;  %1815 = vmatprep.subr.mxu1 %v1549_v16  ;;  %v1540_v49 = vmul.f32 %v965_v15, %v2776_v40  ;;  %v1530_v59 = vmul.f32 %v957_v34, %v2762_v1  ;;  %v1532_v0 = vmul.f32 %v965_v15, %v2766_v32  ;;  %1745 = vmatpush1.msra.mxu0 %v1546_v17 }
  0x85   : > { %v380_v37 = vsub.f32 1.0, %v2921_v43  ;;  %1816 = vmatpush1.msra.mxu1 %v1548_v10  ;;  %v1523_v4 = vmul.f32 %v929_v47, %v2774_v39  ;;  %v937_v50 = vrot.slane %v2866_v44, %v2737_v61  ;;  %v925_v13 = vrot.slane %v2866_v44, %v2651_v3  ;;  %1746 = vmatprep.subr.mxu0 %v1539_v36 }
  0x86   : > { %v381_v58 = vsub.f32 1.0, %v2932_v55  ;;  %1817 = vmatprep.subr.mxu1 %v1541_v19  ;;  %v933_v16 = vrot.slane %v2866_v44, %v2654_v6  ;;  %v1515_v35 = vmul.f32 %v929_v47, %v2764_v31  ;;  %v897_v43 = vrot.slane %v2868_v51, %v2648_v2  ;;  %1747 = vmatpush1.msra.mxu0 %v1538_v53 }
  0x87   : > { %v382_v17 = vsub.f32 1.0, %v2938_v60  ;;  %1818 = vmatpush1.msra.mxu1 %v1540_v49  ;;  %v1525_v10 = vmul.f32 %v937_v50, %v2778_v41  ;;  %v1522_v14 = vmul.f32 %v925_v13, %v2772_v38  ;;  %v1517_v55 = vmul.f32 %v937_v50, %v2770_v33  ;;  %1748 = vmatprep.subr.mxu0 %v1531_v56 }
  0x88   : > { %v383_v36 = vsub.f32 1.0, %v2943_v5  ;;  %1819 = vmatprep.subr.mxu1 %v1533_v46  ;;  %v1524_v34 = vmul.f32 %v933_v16, %v2776_v40  ;;  %v1514_v42 = vmul.f32 %v925_v13, %v2762_v1  ;;  %v1516_v15 = vmul.f32 %v933_v16, %v2766_v32  ;;  %1749 = vmatpush1.msra.mxu0 %v1530_v59 }
  0x89   : > { %v384_v60 = vsub.f32 1.0, %v2951_v9  ;;  %1820 = vmatpush1.msra.mxu1 %v1532_v0  ;;  %v1507_v47 = vmul.f32 %v897_v43, %v2774_v39  ;;  %v905_v19 = vrot.slane %v2868_v51, %v2737_v61  ;;  %v893_v5 = vrot.slane %v2868_v51, %v2651_v3  ;;  %1750 = vmatprep.subr.mxu0 %v1523_v4 }
  0x8a   : > { %v385_v56 = vsub.f32 1.0, %v2961_v57  ;;  %1821 = vmatprep.subr.mxu1 %v1525_v10  ;;  %v901_v53 = vrot.slane %v2868_v51, %v2654_v6  ;;  %v1499_v46 = vmul.f32 %v897_v43, %v2764_v31  ;;  %v865_v9 = vrot.slane %v2870_v8, %v2648_v2  ;;  %1751 = vmatpush1.msra.mxu0 %v1522_v14 }
  0x8b   : > { %v3008_v49 = vmax.f32 %v378_v48, 0.0  ;;  %1822 = vmatpush1.msra.mxu1 %v1524_v34  ;;  %v1509_v59 = vmul.f32 %v905_v19, %v2778_v41  ;;  %v1506_v0 = vmul.f32 %v893_v5, %v2772_v38  ;;  %v1501_v57 = vmul.f32 %v905_v19, %v2770_v33  ;;  %1752 = vmatprep.subr.mxu0 %v1515_v35 }
  0x8c   : > { %v3013_v4 = vmax.f32 %v379_v54, 0.0  ;;  %1823 = vmatprep.subr.mxu1 %v1517_v55  ;;  %v1508_v50 = vmul.f32 %v901_v53, %v2776_v40  ;;  %v1498_v13 = vmul.f32 %v893_v5, %v2762_v1  ;;  %v1500_v16 = vmul.f32 %v901_v53, %v2766_v32  ;;  %1753 = vmatpush1.msra.mxu0 %v1514_v42 }
  0x8d   : > { %v3018_v48 = vmax.f32 %v380_v37, 0.0  ;;  %1824 = vmatpush1.msra.mxu1 %v1516_v15  ;;  %v1491_v43 = vmul.f32 %v865_v9, %v2774_v39  ;;  %v873_v10 = vrot.slane %v2870_v8, %v2737_v61  ;;  %v861_v54 = vrot.slane %v2870_v8, %v2651_v3  ;;  %1754 = vmatprep.subr.mxu0 %v1507_v47 }
  0x8e   : > { %v3025_v35 = vmax.f32 %v381_v58, 0.0  ;;  %1825 = vmatprep.subr.mxu1 %v1509_v59  ;;  %v869_v14 = vrot.slane %v2870_v8, %v2654_v6  ;;  %v1483_v37 = vmul.f32 %v865_v9, %v2764_v31  ;;  %v833_v55 = vrot.slane %v2872_v52, %v2648_v2  ;;  %1755 = vmatpush1.msra.mxu0 %v1506_v0 }
  0x8f   : > { %v3032_v34 = vmax.f32 %v382_v17, 0.0  ;;  %1826 = vmatpush1.msra.mxu1 %v1508_v50  ;;  %v1493_v42 = vmul.f32 %v873_v10, %v2778_v41  ;;  %v1490_v15 = vmul.f32 %v861_v54, %v2772_v38  ;;  %v1485_v58 = vmul.f32 %v873_v10, %v2770_v33  ;;  %1756 = vmatprep.subr.mxu0 %v1499_v46 }
  0x90   : > { %v399_v47 = vmax.f32 %v383_v36, 0.0  ;;  %1827 = vmatprep.subr.mxu1 %v1501_v57  ;;  %v1492_v19 = vmul.f32 %v869_v14, %v2776_v40  ;;  %v1482_v5 = vmul.f32 %v861_v54, %v2762_v1  ;;  %v1484_v53 = vmul.f32 %v869_v14, %v2766_v32  ;;  %1757 = vmatpush1.msra.mxu0 %v1498_v13 }
  0x91   : > { %v400_v9 = vmax.f32 %v384_v60, 0.0  ;;  %1828 = vmatpush1.msra.mxu1 %v1500_v16  ;;  %v1475_v17 = vmul.f32 %v833_v55, %v2774_v39  ;;  %v841_v59 = vrot.slane %v2872_v52, %v2737_v61  ;;  %v829_v0 = vrot.slane %v2872_v52, %v2651_v3  ;;  %1758 = vmatprep.subr.mxu0 %v1491_v43 }
  0x92   : > { %v401_v36 = vmax.f32 %v385_v56, 0.0  ;;  %1829 = vmatprep.subr.mxu1 %v1493_v42  ;;  %v837_v46 = vrot.slane %v2872_v52, %v2654_v6  ;;  %v1467_v57 = vmul.f32 %v833_v55, %v2764_v31  ;;  %v691_v60 = vcombine.high %v3008_v49, %v3013_v4  ;;  %1759 = vmatpush1.msra.mxu0 %v1490_v15 }
  0x93   : > { %1830 = vmatpush1.msra.mxu1 %v1492_v19  ;;  %v1477_v50 = vmul.f32 %v841_v59, %v2778_v41  ;;  %v1474_v13 = vmul.f32 %v829_v0, %v2772_v38  ;;  %v1469_v16 = vmul.f32 %v841_v59, %v2770_v33  ;;  %1760 = vmatprep.subr.mxu0 %v1483_v37  ;;  %v519_v54 = vsub.f32 1.0, %v2754_v21 }
  0x94   : > { %1831 = vmatprep.subr.mxu1 %v1485_v58  ;;  %v1476_v56 = vmul.f32 %v837_v46, %v2776_v40  ;;  %v1466_v43 = vmul.f32 %v829_v0, %v2762_v1  ;;  %v1468_v10 = vmul.f32 %v837_v46, %v2766_v32  ;;  %1761 = vmatpush1.msra.mxu0 %v1482_v5 }
  0x95   : > { %1832 = vmatpush1.msra.mxu1 %v1484_v53  ;;  %v693_v14 = vcombine.high %v3018_v48, %v3025_v35  ;;  %v695_v55 = vcombine.high %v3032_v34, %v399_v47  ;;  %v697_v42 = vcombine.high %v400_v9, %v401_v36  ;;  %1762 = vmatprep.subr.mxu0 %v1475_v17 }
  0x96   : > { %1833 = vmatprep.subr.mxu1 %v1477_v50  ;;  %v711_v37 = vrot.slane %v691_v60, %v2746_v18  ;;  %v690_v15 = vcombine.low %v3008_v49, %v3013_v4  ;;  %v692_v58 = vcombine.low %v3018_v48, %v3025_v35  ;;  %1763 = vmatpush1.msra.mxu0 %v1474_v13  ;;  %v3072_v49 = vmax.f32 %v519_v54, 0.0 }
  0x97   : > { %1834 = vmatpush1.msra.mxu1 %v1476_v56  ;;  %v725_v21 = vrot.slane %v693_v14, %v2746_v18  ;;  %v739_v19 = vrot.slane %v695_v55, %v2746_v18  ;;  %v753_v5 = vrot.slane %v697_v42, %v2746_v18  ;;  %1764 = vmatprep.subr.mxu0 %v1467_v57 }
  0x98   : > { %1835 = vmatprep.subr.mxu1 %v1469_v16  ;;  %v694_v53 = vcombine.low %v3032_v34, %v399_v47  ;;  %v696_v17 = vcombine.low %v400_v9, %v401_v36  ;;  %v3070_v59 = vrot.slane %v690_v15, %v2746_v18  ;;  %1765 = vmatpush1.msra.mxu0 %v1466_v43 }
  0x99   : > { %1836 = vmatpush1.msra.mxu1 %v1468_v10  ;;  %v757_v4 = vcombine.high %v711_v37, %v725_v21  ;;  %v761_v48 = vcombine.high %v739_v19, %v753_v5  ;;  %v756_v35 = vcombine.low %v711_v37, %v725_v21  ;;  %v760_v0 = vcombine.low %v739_v19, %v753_v5 }
  0x9a   : > { %v3075_v46 = vrot.slane %v692_v58, %v2746_v18  ;;  %v3078_v57 = vrot.slane %v694_v53, %v2746_v18  ;;  %v3081_v34 = vrot.slane %v696_v17, %v2746_v18  ;;  %v3088_v60 = vrot.slane %v2858_v22, %v2740_v62 }
  0x9b   : > { %v789_v47 = vrot.slane %v757_v4, %v2746_v18  ;;  %v817_v9 = vrot.slane %v761_v48, %v2746_v18  ;;  %v775_v36 = vrot.slane %v756_v35, %v2746_v18  ;;  %v803_v50 = vrot.slane %v760_v0, %v2746_v18 }
  0x9c   : > { %v755_v13 = vcombine.high %v3070_v59, %v3075_v46  ;;  %v759_v16 = vcombine.high %v3078_v57, %v3081_v34  ;;  %v3105_v14 = vmul.f32 %v3088_v60, %v3072_v49 }
  0x9d   : > { %v3097_v43 = vcombine.high %v789_v47, %v817_v9  ;;  %v3099_v10 = vcombine.low %v789_v47, %v817_v9  ;;  %v3107_v55 = vcombine.high %v775_v36, %v803_v50  ;;  %v3109_v42 = vcombine.low %v775_v36, %v803_v50 }
  0x9e   : > { %v3112_v37 = vrot.slane %v755_v13, %v2746_v18  ;;  %v3115_v15 = vrot.slane %v759_v16, %v2746_v18 }
  0x9f   : > { %3669 = vst [vmem:[#allocation15_spill] sm:$0xff] %v3099_v10  ;;  %3670 = vst [vmem:[#allocation16_spill] sm:$0xff] %v3107_v55  ;;  %v1313_v58 = vrot.slane %v3097_v43, %v2648_v2  ;;  %v1321_v21 = vrot.slane %v3097_v43, %v2737_v61  ;;  %v1309_v19 = vrot.slane %v3097_v43, %v2651_v3 }
  0xa0   : > { %3671 = vst [vmem:[#allocation17_spill] sm:$0xff] %v3109_v42  ;;  %v1317_v5 = vrot.slane %v3097_v43, %v2654_v6  ;;  %v1281_v53 = vrot.slane %v3107_v55, %v2648_v2  ;;  %v1289_v17 = vrot.slane %v3107_v55, %v2737_v61  ;;  %v1277_v4 = vrot.slane %v3107_v55, %v2651_v3 }
  0xa1   : > { %v1285_v48 = vrot.slane %v3107_v55, %v2654_v6  ;;  %v1715_v35 = vmul.f32 %v1313_v58, %v2774_v39  ;;  %v1717_v0 = vmul.f32 %v1321_v21, %v2778_v41  ;;  %v1714_v47 = vmul.f32 %v1309_v19, %v2772_v38 }
  0xa2   : > { %v1716_v9 = vmul.f32 %v1317_v5, %v2776_v40  ;;  %v1707_v36 = vmul.f32 %v1313_v58, %v2764_v31  ;;  %v1709_v50 = vmul.f32 %v1321_v21, %v2770_v33  ;;  %v1706_v13 = vmul.f32 %v1309_v19, %v2762_v1 }
  0xa3   : > { %v1708_v16 = vmul.f32 %v1317_v5, %v2766_v32  ;;  %1766 = vmatprep.subr.mxu0 %v1715_v35  ;;  %1837 = vmatprep.subr.mxu1 %v1717_v0  ;;  %v1699_v54 = vmul.f32 %v1281_v53, %v2774_v39  ;;  %v1701_v56 = vmul.f32 %v1289_v17, %v2778_v41 }
  0xa4   : > { %v1698_v12 = vmul.f32 %v1277_v4, %v2772_v38  ;;  %1767 = vmatpush2.msra.mxu0 %v1714_v47  ;;  %1838 = vmatpush2.msra.mxu1 %v1716_v9  ;;  %v1700_v55 = vmul.f32 %v1285_v48, %v2776_v40  ;;  %v1691_v58 = vmul.f32 %v1281_v53, %v2764_v31 }
  0xa5   : > { %v1693_v21 = vmul.f32 %v1289_v17, %v2770_v33  ;;  %1768 = vmatprep.subr.mxu0 %v1707_v36  ;;  %1839 = vmatprep.subr.mxu1 %v1709_v50  ;;  %v1690_v19 = vmul.f32 %v1277_v4, %v2762_v1  ;;  %v1692_v5 = vmul.f32 %v1285_v48, %v2766_v32 }
  0xa6   : > { %v1249_v35 = vrot.slane %v3099_v10, %v2648_v2  ;;  %1769 = vmatpush2.msra.mxu0 %v1706_v13  ;;  %1840 = vmatpush2.msra.mxu1 %v1708_v16  ;;  %v1257_v0 = vrot.slane %v3099_v10, %v2737_v61  ;;  %v1245_v47 = vrot.slane %v3099_v10, %v2651_v3 }
  0xa7   : > { %v1253_v53 = vrot.slane %v3099_v10, %v2654_v6  ;;  %1770 = vmatprep.subr.mxu0 %v1699_v54  ;;  %1841 = vmatprep.subr.mxu1 %v1701_v56  ;;  %v1217_v48 = vrot.slane %v3109_v42, %v2648_v2  ;;  %v3672_v13 = vsub.f32 %v2692_v24, %v2697_v26 }
  0xa8   : > { %v1683_v17 = vmul.f32 %v1249_v35, %v2774_v39  ;;  %v1675_v4 = vmul.f32 %v1249_v35, %v2764_v31  ;;  %1771 = vmatpush2.msra.mxu0 %v1698_v12  ;;  %1842 = vmatpush2.msra.mxu1 %v1700_v55  ;;  %v1685_v9 = vmul.f32 %v1257_v0, %v2778_v41 }
  0xa9   : > { %v1682_v36 = vmul.f32 %v1245_v47, %v2772_v38  ;;  %v1684_v50 = vmul.f32 %v1253_v53, %v2776_v40  ;;  %v3167_v54 = vand.u32 2147483647, %v3672_v13  ;;  %1772 = vmatprep.subr.mxu0 %v1691_v58  ;;  %1843 = vmatprep.subr.mxu1 %v1693_v21  ;;  %v1677_v56 = vmul.f32 %v1257_v0, %v2770_v33 }
  0xaa   : > { %v1674_v16 = vmul.f32 %v1245_v47, %v2762_v1  ;;  %v1676_v12 = vmul.f32 %v1253_v53, %v2766_v32  ;;  %v3673_v55 = vsub.f32 %v2692_v24, %v2700_v27  ;;  %1773 = vmatpush2.msra.mxu0 %v1690_v19  ;;  %1844 = vmatpush2.msra.mxu1 %v1692_v5 }
  0xab   : > { %v1667_v10 = vmul.f32 %v1217_v48, %v2774_v39  ;;  %v1225_v13 = vrot.slane %v3109_v42, %v2737_v61  ;;  %v1213_v58 = vrot.slane %v3109_v42, %v2651_v3  ;;  %v3674_v21 = vsub.f32 %v2692_v24, %v2703_v28  ;;  %1774 = vmatprep.subr.mxu0 %v1683_v17 }
  0xac   : > { %v3175_v35 = vand.u32 2147483647, %v3673_v55  ;;  %1845 = vmatprep.subr.mxu1 %v1685_v9  ;;  %v1221_v27 = vrot.slane %v3109_v42, %v2654_v6  ;;  %v1659_v19 = vmul.f32 %v1217_v48, %v2764_v31  ;;  %v3192_v5 = vcombine.high %v3112_v37, %v3115_v15  ;;  %1775 = vmatpush2.msra.mxu0 %v1682_v36 }
  0xad   : > { %v3185_v0 = vand.u32 2147483647, %v3674_v21  ;;  %v3675_v47 = vsub.f32 %v2692_v24, %v2706_v29  ;;  %1846 = vmatpush2.msra.mxu1 %v1684_v50  ;;  %v1669_v55 = vmul.f32 %v1225_v13, %v2778_v41  ;;  %v1666_v17 = vmul.f32 %v1213_v58, %v2772_v38  ;;  %1776 = vmatprep.subr.mxu0 %v1675_v4 }
  0xae   : > { %v1661_v9 = vmul.f32 %v1225_v13, %v2770_v33  ;;  %v3676_v48 = vsub.f32 %v2694_v25, %v2697_v26  ;;  %1847 = vmatprep.subr.mxu1 %v1677_v56  ;;  %v1668_v42 = vmul.f32 %v1221_v27, %v2776_v40  ;;  %v1658_v24 = vmul.f32 %v1213_v58, %v2762_v1 }
  0xaf   : > { %v3197_v53 = vand.u32 2147483647, %v3675_v47  ;;  %v1660_v36 = vmul.f32 %v1221_v27, %v2766_v32  ;;  %v3677_v50 = vsub.f32 %v2694_v25, %v2703_v28  ;;  %1777 = vmatpush2.msra.mxu0 %v1674_v16  ;;  %1848 = vmatpush2.msra.mxu1 %v1676_v12  ;;  %v1185_v26 = vrot.slane %v3192_v5, %v2648_v2 }
  0xb0   : > { %v3205_v21 = vand.u32 2147483647, %v3676_v48  ;;  %v1193_v4 = vrot.slane %v3192_v5, %v2737_v61  ;;  %v1181_v56 = vrot.slane %v3192_v5, %v2651_v3  ;;  %v3678_v13 = vsub.f32 %v2694_v25, %v2706_v29  ;;  %1778 = vmatprep.subr.mxu0 %v1667_v10  ;;  %1849 = vmatprep.subr.mxu1 %v1669_v55 }
  0xb1   : > { %v3213_v47 = vand.u32 2147483647, %v3677_v50  ;;  %v1189_v28 = vrot.slane %v3192_v5, %v2654_v6  ;;  %v3679_v16 = vcombine.low %v3070_v59, %v3075_v46  ;;  %v3680_v27 = vcombine.low %v3078_v57, %v3081_v34  ;;  %1779 = vmatpush2.msra.mxu0 %v1666_v17  ;;  %1850 = vmatpush2.msra.mxu1 %v1668_v42 }
  0xb2   : > { %v3224_v58 = vand.u32 2147483647, %v3678_v13  ;;  %v510_v50 = vsub.f32 1.0, %v3167_v54  ;;  %v1651_v25 = vmul.f32 %v1185_v26, %v2774_v39  ;;  %v1653_v29 = vmul.f32 %v1193_v4, %v2778_v41  ;;  %1780 = vmatprep.subr.mxu0 %v1659_v19  ;;  %1851 = vmatprep.subr.mxu1 %v1661_v9 }
  0xb3   : > { %v768_v12 = vrot.slane %v3679_v16, %v2746_v18  ;;  %v796_v48 = vrot.slane %v3680_v27, %v2746_v18  ;;  %v1650_v10 = vmul.f32 %v1181_v56, %v2772_v38  ;;  %v511_v55 = vsub.f32 1.0, %v3175_v35  ;;  %1781 = vmatpush2.msra.mxu0 %v1658_v24  ;;  %1852 = vmatpush2.msra.mxu1 %v1660_v36 }
  0xb4   : > { %v1652_v59 = vmul.f32 %v1189_v28, %v2776_v40  ;;  %v1643_v46 = vmul.f32 %v1185_v26, %v2764_v31  ;;  %v1645_v57 = vmul.f32 %v1193_v4, %v2770_v33  ;;  %v512_v34 = vsub.f32 1.0, %v3185_v0  ;;  %1782 = vmatprep.subr.mxu0 %v1651_v25  ;;  %1853 = vmatprep.subr.mxu1 %v1653_v29 }
  0xb5   : > { %v1642_v42 = vmul.f32 %v1181_v56, %v2762_v1  ;;  %v1644_v54 = vmul.f32 %v1189_v28, %v2766_v32  ;;  %v3247_v17 = vcombine.high %v768_v12, %v796_v48  ;;  %v513_v35 = vsub.f32 1.0, %v3197_v53  ;;  %1783 = vmatpush2.msra.mxu0 %v1650_v10 }
  0xb6   : > { %v3252_v19 = vcombine.low %v3112_v37, %v3115_v15  ;;  %v3254_v9 = vcombine.low %v768_v12, %v796_v48  ;;  %v3258_v0 = vrot.slane %v2858_v22, %v2743_v63  ;;  %v518_v24 = vsub.f32 1.0, %v3205_v21  ;;  %1854 = vmatpush2.msra.mxu1 %v1652_v59  ;;  %1784 = vmatprep.subr.mxu0 %v1643_v46 }
  0xb7   : > { %v1153_v36 = vrot.slane %v3247_v17, %v2648_v2  ;;  %v1161_v53 = vrot.slane %v3247_v17, %v2737_v61  ;;  %v1149_v37 = vrot.slane %v3247_v17, %v2651_v3  ;;  %v520_v15 = vsub.f32 1.0, %v3213_v47  ;;  %1855 = vmatprep.subr.mxu1 %v1645_v57  ;;  %1785 = vmatpush2.msra.mxu0 %v1642_v42 }
  0xb8   : > { %v1157_v26 = vrot.slane %v3247_v17, %v2654_v6  ;;  %v1121_v21 = vrot.slane %v3252_v19, %v2648_v2  ;;  %v1129_v4 = vrot.slane %v3252_v19, %v2737_v61  ;;  %v521_v56 = vsub.f32 1.0, %v3224_v58  ;;  %1856 = vmatpush2.msra.mxu1 %v1644_v54 }
  0xb9   : > { %v1635_v13 = vmul.f32 %v1153_v36, %v2774_v39  ;;  %v1637_v28 = vmul.f32 %v1161_v53, %v2778_v41  ;;  %v1634_v47 = vmul.f32 %v1149_v37, %v2772_v38  ;;  %v1627_v12 = vmul.f32 %v1153_v36, %v2764_v31 }
  0xba   : > { %v1636_v16 = vmul.f32 %v1157_v26, %v2776_v40  ;;  %v1629_v27 = vmul.f32 %v1161_v53, %v2770_v33  ;;  %v1626_v48 = vmul.f32 %v1149_v37, %v2762_v1  ;;  %v3282_v25 = vmax.f32 %v510_v50, 0.0 }
  0xbb   : > { %1786 = vmatprep.subr.mxu0 %v1635_v13  ;;  %1857 = vmatprep.subr.mxu1 %v1637_v28  ;;  %v1628_v58 = vmul.f32 %v1157_v26, %v2766_v32  ;;  %v1619_v29 = vmul.f32 %v1121_v21, %v2774_v39  ;;  %v1621_v10 = vmul.f32 %v1129_v4, %v2778_v41  ;;  %v3287_v59 = vmax.f32 %v511_v55, 0.0 }
  0xbc   : > { %1787 = vmatpush2.msra.mxu0 %v1634_v47  ;;  %1858 = vmatpush2.msra.mxu1 %v1636_v16  ;;  %v1117_v46 = vrot.slane %v3252_v19, %v2651_v3  ;;  %v1125_v57 = vrot.slane %v3252_v19, %v2654_v6  ;;  %v1611_v50 = vmul.f32 %v1121_v21, %v2764_v31  ;;  %v3294_v42 = vmax.f32 %v521_v56, 0.0 }
  0xbd   : > { %1788 = vmatprep.subr.mxu0 %v1627_v12  ;;  %1859 = vmatprep.subr.mxu1 %v1629_v27  ;;  %v1613_v54 = vmul.f32 %v1129_v4, %v2770_v33  ;;  %v1089_v55 = vrot.slane %v3254_v9, %v2648_v2  ;;  %v1097_v36 = vrot.slane %v3254_v9, %v2737_v61  ;;  %v3301_v53 = vmax.f32 %v512_v34, 0.0 }
  0xbe   : > { %1789 = vmatpush2.msra.mxu0 %v1626_v48  ;;  %1860 = vmatpush2.msra.mxu1 %v1628_v58  ;;  %v1618_v37 = vmul.f32 %v1117_v46, %v2772_v38  ;;  %v1620_v26 = vmul.f32 %v1125_v57, %v2776_v40  ;;  %v1610_v21 = vmul.f32 %v1117_v46, %v2762_v1  ;;  %v3306_v56 = vmax.f32 %v518_v24, 0.0 }
  0xbf   : > { %1790 = vmatprep.subr.mxu0 %v1619_v29  ;;  %1861 = vmatprep.subr.mxu1 %v1621_v10  ;;  %v1612_v4 = vmul.f32 %v1125_v57, %v2766_v32  ;;  %v1603_v2 = vmul.f32 %v1089_v55, %v2774_v39  ;;  %v1605_v61 = vmul.f32 %v1097_v36, %v2778_v41  ;;  %v3311_v34 = vmax.f32 %v513_v35, 0.0 }
  0xc0   : > { %1791 = vmatpush2.msra.mxu0 %v1618_v37  ;;  %1862 = vmatpush2.msra.mxu1 %v1620_v26  ;;  %v1085_v13 = vrot.slane %v3254_v9, %v2651_v3  ;;  %v1093_v28 = vrot.slane %v3254_v9, %v2654_v6  ;;  %v1595_v24 = vmul.f32 %v1089_v55, %v2764_v31  ;;  %v3318_v47 = vmax.f32 %v520_v15, 0.0 }
  0xc1   : > { %1792 = vmatprep.subr.mxu0 %v1611_v50  ;;  %1863 = vmatprep.subr.mxu1 %v1613_v54  ;;  %v1597_v39 = vmul.f32 %v1097_v36, %v2770_v33  ;;  %v1593_v41 = vmul.f32 %v3258_v0, %v3294_v42  ;;  %v1069_v35 = vrot.slane %v2858_v22, %v2657_v7 }
  0xc2   : > { %1793 = vmatpush2.msra.mxu0 %v1610_v21  ;;  %1864 = vmatpush2.msra.mxu1 %v1612_v4  ;;  %v1602_v3 = vmul.f32 %v1085_v13, %v2772_v38  ;;  %v1604_v6 = vmul.f32 %v1093_v28, %v2776_v40  ;;  %v1594_v31 = vmul.f32 %v1085_v13, %v2762_v1 }
  0xc3   : > { %1794 = vmatprep.subr.mxu0 %v1603_v2  ;;  %1865 = vmatprep.subr.mxu1 %v1605_v61  ;;  %v1596_v15 = vmul.f32 %v1093_v28, %v2766_v32  ;;  %v1590_v33 = vmul.f32 %v1069_v35, %v3306_v56  ;;  %v1077_v16 = vrot.slane %v2858_v22, %v2662_v11 }
  0xc4   : > { %1795 = vmatpush2.msra.mxu0 %v1602_v3  ;;  %1866 = vmatpush2.msra.mxu1 %v1604_v6  ;;  %v1583_v12 = vmul.f32 %v3088_v60, %v3287_v59  ;;  %v1585_v38 = vmul.f32 %v3258_v0, %v3311_v34  ;;  %v1582_v40 = vmul.f32 %v1069_v35, %v3282_v25 }
  0xc5   : > { %1796 = vmatprep.subr.mxu0 %v1595_v24  ;;  %1867 = vmatprep.subr.mxu1 %v1597_v39  ;;  %v1592_v1 = vmul.f32 %v1077_v16, %v3318_v47  ;;  %v1584_v32 = vmul.f32 %v1077_v16, %v3301_v53  ;;  %v1041_v27 = vrot.slane %v2860_v23, %v2740_v62 }
  0xc6   : > { %1797 = vmatpush2.msra.mxu0 %v1594_v31  ;;  %1868 = vmatpush2.msra.mxu1 %v1596_v15  ;;  %v1049_v22 = vrot.slane %v2860_v23, %v2743_v63  ;;  %v1037_v60 = vrot.slane %v2860_v23, %v2657_v7  ;;  %v1045_v0 = vrot.slane %v2860_v23, %v2662_v11 }
  0xc7   : > { %1799 = vmatmul.mubr.f32.vlgmr.msra.gmra.mxu0 %v2752_v20  ;;  %1870 = vmatmul.mubr.f32.vlgmr.msra.gmra.mxu1 %v2752_v20  ;;  %v1575_v48 = vmul.f32 %v1041_v27, %v3072_v49  ;;  %v1567_v58 = vmul.f32 %v1041_v27, %v3287_v59  ;;  %v1009_v29 = vrot.slane %v2862_v45, %v2740_v62 }
  0xc8   : > { %1876 = vmatprep.subr.mxu0 %v3105_v14  ;;  %1947 = vmatprep.subr.mxu1 %v1593_v41  ;;  %v1577_v10 = vmul.f32 %v1049_v22, %v3294_v42  ;;  %v1574_v46 = vmul.f32 %v1037_v60, %v3306_v56  ;;  %v1576_v23 = vmul.f32 %v1045_v0, %v3318_v47 }
  0xc9   : > { %1877 = vmatpush1.msra.mxu0 %v1590_v33  ;;  %1948 = vmatpush1.msra.mxu1 %v1592_v1  ;;  %v1569_v57 = vmul.f32 %v1049_v22, %v3311_v34  ;;  %v1566_v50 = vmul.f32 %v1037_v60, %v3282_v25  ;;  %v1568_v54 = vmul.f32 %v1045_v0, %v3301_v53 }
  0xca   : > { %1878 = vmatprep.subr.mxu0 %v1583_v12  ;;  %1949 = vmatprep.subr.mxu1 %v1585_v38  ;;  %v1559_v55 = vmul.f32 %v1009_v29, %v3072_v49  ;;  %v1017_v14 = vrot.slane %v2862_v45, %v2743_v63  ;;  %v1005_v36 = vrot.slane %v2862_v45, %v2657_v7 }
  0xcb   : > { %1879 = vmatpush1.msra.mxu0 %v1582_v40  ;;  %1950 = vmatpush1.msra.mxu1 %v1584_v32  ;;  %v1013_v37 = vrot.slane %v2862_v45, %v2662_v11  ;;  %v1551_v26 = vmul.f32 %v1009_v29, %v3287_v59  ;;  %v977_v21 = vrot.slane %v2864_v30, %v2740_v62 }
  0xcc   : > { %1880 = vmatprep.subr.mxu0 %v1575_v48  ;;  %1951 = vmatprep.subr.mxu1 %v1577_v10  ;;  %v1561_v4 = vmul.f32 %v1017_v14, %v3294_v42  ;;  %v1558_v2 = vmul.f32 %v1005_v36, %v3306_v56  ;;  %v1553_v61 = vmul.f32 %v1017_v14, %v3311_v34 }
  0xcd   : > { %1881 = vmatpush1.msra.mxu0 %v1574_v46  ;;  %1952 = vmatpush1.msra.mxu1 %v1576_v23  ;;  %v1560_v13 = vmul.f32 %v1013_v37, %v3318_v47  ;;  %v1550_v28 = vmul.f32 %v1005_v36, %v3282_v25  ;;  %v1552_v45 = vmul.f32 %v1013_v37, %v3301_v53 }
  0xce   : > { %1882 = vmatprep.subr.mxu0 %v1567_v58  ;;  %1953 = vmatprep.subr.mxu1 %v1569_v57  ;;  %v1543_v24 = vmul.f32 %v977_v21, %v3072_v49  ;;  %v985_v39 = vrot.slane %v2864_v30, %v2743_v63  ;;  %v973_v41 = vrot.slane %v2864_v30, %v2657_v7 }
  0xcf   : > { %1883 = vmatpush1.msra.mxu0 %v1566_v50  ;;  %1954 = vmatpush1.msra.mxu1 %v1568_v54  ;;  %v981_v35 = vrot.slane %v2864_v30, %v2662_v11  ;;  %v1535_v3 = vmul.f32 %v977_v21, %v3287_v59  ;;  %v945_v6 = vrot.slane %v2866_v44, %v2740_v62 }
  0xd0   : > { %1884 = vmatprep.subr.mxu0 %v1559_v55  ;;  %1955 = vmatprep.subr.mxu1 %v1561_v4  ;;  %v1545_v31 = vmul.f32 %v985_v39, %v3294_v42  ;;  %v1542_v15 = vmul.f32 %v973_v41, %v3306_v56  ;;  %v1537_v33 = vmul.f32 %v985_v39, %v3311_v34 }
  0xd1   : > { %1885 = vmatpush1.msra.mxu0 %v1558_v2  ;;  %1956 = vmatpush1.msra.mxu1 %v1560_v13  ;;  %v1544_v16 = vmul.f32 %v981_v35, %v3318_v47  ;;  %v1534_v12 = vmul.f32 %v973_v41, %v3282_v25  ;;  %v1536_v30 = vmul.f32 %v981_v35, %v3301_v53 }
  0xd2   : > { %1886 = vmatprep.subr.mxu0 %v1551_v26  ;;  %1957 = vmatprep.subr.mxu1 %v1553_v61  ;;  %v1527_v38 = vmul.f32 %v945_v6, %v3072_v49  ;;  %v953_v40 = vrot.slane %v2866_v44, %v2743_v63  ;;  %v941_v1 = vrot.slane %v2866_v44, %v2657_v7 }
  0xd3   : > { %1887 = vmatpush1.msra.mxu0 %v1550_v28  ;;  %1958 = vmatpush1.msra.mxu1 %v1552_v45  ;;  %v949_v32 = vrot.slane %v2866_v44, %v2662_v11  ;;  %v1519_v27 = vmul.f32 %v945_v6, %v3287_v59  ;;  %v913_v22 = vrot.slane %v2868_v51, %v2740_v62 }
  0xd4   : > { %1888 = vmatprep.subr.mxu0 %v1543_v24  ;;  %1959 = vmatprep.subr.mxu1 %v1545_v31  ;;  %v1529_v60 = vmul.f32 %v953_v40, %v3294_v42  ;;  %v1526_v0 = vmul.f32 %v941_v1, %v3306_v56  ;;  %v1521_v48 = vmul.f32 %v953_v40, %v3311_v34 }
  0xd5   : > { %1889 = vmatpush1.msra.mxu0 %v1542_v15  ;;  %1960 = vmatpush1.msra.mxu1 %v1544_v16  ;;  %v1528_v58 = vmul.f32 %v949_v32, %v3318_v47  ;;  %v1518_v29 = vmul.f32 %v941_v1, %v3282_v25  ;;  %v1520_v44 = vmul.f32 %v949_v32, %v3301_v53 }
  0xd6   : > { %1890 = vmatprep.subr.mxu0 %v1535_v3  ;;  %1961 = vmatprep.subr.mxu1 %v1537_v33  ;;  %v1511_v10 = vmul.f32 %v913_v22, %v3072_v49  ;;  %v921_v46 = vrot.slane %v2868_v51, %v2743_v63  ;;  %v909_v23 = vrot.slane %v2868_v51, %v2657_v7 }
  0xd7   : > { %1891 = vmatpush1.msra.mxu0 %v1534_v12  ;;  %1962 = vmatpush1.msra.mxu1 %v1536_v30  ;;  %v917_v57 = vrot.slane %v2868_v51, %v2662_v11  ;;  %v1503_v50 = vmul.f32 %v913_v22, %v3287_v59  ;;  %v881_v54 = vrot.slane %v2870_v8, %v2740_v62 }
  0xd8   : > { %1892 = vmatprep.subr.mxu0 %v1527_v38  ;;  %1963 = vmatprep.subr.mxu1 %v1529_v60  ;;  %v1513_v55 = vmul.f32 %v921_v46, %v3294_v42  ;;  %v1510_v14 = vmul.f32 %v909_v23, %v3306_v56  ;;  %v1505_v36 = vmul.f32 %v921_v46, %v3311_v34 }
  0xd9   : > { %1893 = vmatpush1.msra.mxu0 %v1526_v0  ;;  %1964 = vmatpush1.msra.mxu1 %v1528_v58  ;;  %v1512_v37 = vmul.f32 %v917_v57, %v3318_v47  ;;  %v1502_v26 = vmul.f32 %v909_v23, %v3282_v25  ;;  %v1504_v51 = vmul.f32 %v917_v57, %v3301_v53 }
  0xda   : > { %1894 = vmatprep.subr.mxu0 %v1519_v27  ;;  %1965 = vmatprep.subr.mxu1 %v1521_v48  ;;  %v1495_v21 = vmul.f32 %v881_v54, %v3072_v49  ;;  %v889_v4 = vrot.slane %v2870_v8, %v2743_v63  ;;  %v877_v2 = vrot.slane %v2870_v8, %v2657_v7  ;;  %v3681_v48 = vld [vmem:[#allocation16_spill] sm:$0xff] }
  0xdb   : > { %1895 = vmatpush1.msra.mxu0 %v1518_v29  ;;  %1966 = vmatpush1.msra.mxu1 %v1520_v44  ;;  %v885_v61 = vrot.slane %v2870_v8, %v2662_v11  ;;  %v1487_v13 = vmul.f32 %v881_v54, %v3287_v59  ;;  %v849_v28 = vrot.slane %v2872_v52, %v2740_v62 }
  0xdc   : > { %1896 = vmatprep.subr.mxu0 %v1511_v10  ;;  %1967 = vmatprep.subr.mxu1 %v1513_v55  ;;  %v1497_v45 = vmul.f32 %v889_v4, %v3294_v42  ;;  %v1494_v24 = vmul.f32 %v877_v2, %v3306_v56  ;;  %v1489_v39 = vmul.f32 %v889_v4, %v3311_v34 }
  0xdd   : > { %1897 = vmatpush1.msra.mxu0 %v1510_v14  ;;  %1968 = vmatpush1.msra.mxu1 %v1512_v37  ;;  %v1496_v41 = vmul.f32 %v885_v61, %v3318_v47  ;;  %v1486_v35 = vmul.f32 %v877_v2, %v3282_v25  ;;  %v1488_v8 = vmul.f32 %v885_v61, %v3301_v53 }
  0xde   : > { %1898 = vmatprep.subr.mxu0 %v1503_v50  ;;  %1969 = vmatprep.subr.mxu1 %v1505_v36  ;;  %v1479_v3 = vmul.f32 %v849_v28, %v3072_v49  ;;  %v857_v6 = vrot.slane %v2872_v52, %v2743_v63  ;;  %v845_v31 = vrot.slane %v2872_v52, %v2657_v7  ;;  %v3682_v36 = vld [vmem:[#allocation15_spill] sm:$0xff] }
  0xdf   : > { %1899 = vmatpush1.msra.mxu0 %v1502_v26  ;;  %1970 = vmatpush1.msra.mxu1 %v1504_v51  ;;  %v853_v15 = vrot.slane %v2872_v52, %v2662_v11  ;;  %v1471_v33 = vmul.f32 %v849_v28, %v3287_v59  ;;  %v1329_v16 = vrot.slane %v3097_v43, %v2740_v62 }
  0xe0   : > { %1900 = vmatprep.subr.mxu0 %v1495_v21  ;;  %1971 = vmatprep.subr.mxu1 %v1497_v45  ;;  %v1481_v12 = vmul.f32 %v857_v6, %v3294_v42  ;;  %v1478_v30 = vmul.f32 %v845_v31, %v3306_v56  ;;  %v1473_v38 = vmul.f32 %v857_v6, %v3311_v34 }
  0xe1   : > { %1901 = vmatpush1.msra.mxu0 %v1494_v24  ;;  %1972 = vmatpush1.msra.mxu1 %v1496_v41  ;;  %v1480_v40 = vmul.f32 %v853_v15, %v3318_v47  ;;  %v1470_v1 = vmul.f32 %v845_v31, %v3282_v25  ;;  %v1472_v52 = vmul.f32 %v853_v15, %v3301_v53  ;;  %v3683_v41 = vld [vmem:[#allocation17_spill] sm:$0xff] }
  0xe2   : > { %1902 = vmatprep.subr.mxu0 %v1487_v13  ;;  %1973 = vmatprep.subr.mxu1 %v1489_v39  ;;  %v1719_v32 = vmul.f32 %v1329_v16, %v3072_v49  ;;  %v1337_v27 = vrot.slane %v3097_v43, %v2743_v63  ;;  %v1325_v22 = vrot.slane %v3097_v43, %v2657_v7 }
  0xe3   : > { %1903 = vmatpush1.msra.mxu0 %v1486_v35  ;;  %1974 = vmatpush1.msra.mxu1 %v1488_v8  ;;  %v1333_v60 = vrot.slane %v3097_v43, %v2662_v11  ;;  %v1711_v0 = vmul.f32 %v1329_v16, %v3287_v59  ;;  %v1297_v58 = vrot.slane %v3681_v48, %v2740_v62 }
  0xe4   : > { %1904 = vmatprep.subr.mxu0 %v1479_v3  ;;  %1975 = vmatprep.subr.mxu1 %v1481_v12  ;;  %v1721_v29 = vmul.f32 %v1337_v27, %v3294_v42  ;;  %v1718_v44 = vmul.f32 %v1325_v22, %v3306_v56  ;;  %v1713_v10 = vmul.f32 %v1337_v27, %v3311_v34 }
  0xe5   : > { %1905 = vmatpush1.msra.mxu0 %v1478_v30  ;;  %1976 = vmatpush1.msra.mxu1 %v1480_v40  ;;  %v1720_v46 = vmul.f32 %v1333_v60, %v3318_v47  ;;  %v1710_v23 = vmul.f32 %v1325_v22, %v3282_v25  ;;  %v1712_v43 = vmul.f32 %v1333_v60, %v3301_v53 }
  0xe6   : > { %1906 = vmatprep.subr.mxu0 %v1471_v33  ;;  %1977 = vmatprep.subr.mxu1 %v1473_v38  ;;  %v1703_v57 = vmul.f32 %v1297_v58, %v3072_v49  ;;  %v1305_v50 = vrot.slane %v3681_v48, %v2743_v63  ;;  %v1293_v54 = vrot.slane %v3681_v48, %v2657_v7 }
  0xe7   : > { %1907 = vmatpush1.msra.mxu0 %v1470_v1  ;;  %1978 = vmatpush1.msra.mxu1 %v1472_v52  ;;  %v1301_v55 = vrot.slane %v3681_v48, %v2662_v11  ;;  %v1695_v14 = vmul.f32 %v1297_v58, %v3287_v59  ;;  %v1265_v37 = vrot.slane %v3682_v36, %v2740_v62 }
  0xe8   : > { %1908 = vmatprep.subr.mxu0 %v1719_v32  ;;  %1979 = vmatprep.subr.mxu1 %v1721_v29  ;;  %v1705_v26 = vmul.f32 %v1305_v50, %v3294_v42  ;;  %v1702_v51 = vmul.f32 %v1293_v54, %v3306_v56  ;;  %v1697_v21 = vmul.f32 %v1305_v50, %v3311_v34 }
  0xe9   : > { %1909 = vmatpush2.msra.mxu0 %v1718_v44  ;;  %1980 = vmatpush2.msra.mxu1 %v1720_v46  ;;  %v1704_v4 = vmul.f32 %v1301_v55, %v3318_v47  ;;  %v1694_v2 = vmul.f32 %v1293_v54, %v3282_v25  ;;  %v1696_v61 = vmul.f32 %v1301_v55, %v3301_v53 }
  0xea   : > { %1910 = vmatprep.subr.mxu0 %v1711_v0  ;;  %1981 = vmatprep.subr.mxu1 %v1713_v10  ;;  %v1687_v13 = vmul.f32 %v1265_v37, %v3072_v49  ;;  %v1273_v28 = vrot.slane %v3682_v36, %v2743_v63  ;;  %v1261_v45 = vrot.slane %v3682_v36, %v2657_v7 }
  0xeb   : > { %1911 = vmatpush2.msra.mxu0 %v1710_v23  ;;  %1982 = vmatpush2.msra.mxu1 %v1712_v43  ;;  %v1269_v24 = vrot.slane %v3682_v36, %v2662_v11  ;;  %v1679_v39 = vmul.f32 %v1265_v37, %v3287_v59  ;;  %v1233_v35 = vrot.slane %v3683_v41, %v2740_v62 }
  0xec   : > { %1912 = vmatprep.subr.mxu0 %v1703_v57  ;;  %1983 = vmatprep.subr.mxu1 %v1705_v26  ;;  %v1689_v8 = vmul.f32 %v1273_v28, %v3294_v42  ;;  %v1686_v3 = vmul.f32 %v1261_v45, %v3306_v56  ;;  %v1681_v6 = vmul.f32 %v1273_v28, %v3311_v34 }
  0xed   : > { %1913 = vmatpush2.msra.mxu0 %v1702_v51  ;;  %1984 = vmatpush2.msra.mxu1 %v1704_v4  ;;  %v1688_v31 = vmul.f32 %v1269_v24, %v3318_v47  ;;  %v1678_v15 = vmul.f32 %v1261_v45, %v3282_v25  ;;  %v1680_v33 = vmul.f32 %v1269_v24, %v3301_v53 }
  0xee   : > { %1914 = vmatprep.subr.mxu0 %v1695_v14  ;;  %1985 = vmatprep.subr.mxu1 %v1697_v21  ;;  %v1671_v16 = vmul.f32 %v1233_v35, %v3072_v49  ;;  %v1241_v12 = vrot.slane %v3683_v41, %v2743_v63  ;;  %v1229_v30 = vrot.slane %v3683_v41, %v2657_v7 }
  0xef   : > { %1915 = vmatpush2.msra.mxu0 %v1694_v2  ;;  %1986 = vmatpush2.msra.mxu1 %v1696_v61  ;;  %v1237_v38 = vrot.slane %v3683_v41, %v2662_v11  ;;  %v1663_v40 = vmul.f32 %v1233_v35, %v3287_v59  ;;  %v1201_v1 = vrot.slane %v3192_v5, %v2740_v62 }
  0xf0   : > { %1916 = vmatprep.subr.mxu0 %v1687_v13  ;;  %1987 = vmatprep.subr.mxu1 %v1689_v8  ;;  %v1673_v52 = vmul.f32 %v1241_v12, %v3294_v42  ;;  %v1670_v32 = vmul.f32 %v1229_v30, %v3306_v56  ;;  %v1665_v27 = vmul.f32 %v1241_v12, %v3311_v34 }
  0xf1   : > { %1917 = vmatpush2.msra.mxu0 %v1686_v3  ;;  %1988 = vmatpush2.msra.mxu1 %v1688_v31  ;;  %v1672_v22 = vmul.f32 %v1237_v38, %v3318_v47  ;;  %v1662_v60 = vmul.f32 %v1229_v30, %v3282_v25  ;;  %v1664_v0 = vmul.f32 %v1237_v38, %v3301_v53 }
  0xf2   : > { %1918 = vmatprep.subr.mxu0 %v1679_v39  ;;  %1989 = vmatprep.subr.mxu1 %v1681_v6  ;;  %v1655_v48 = vmul.f32 %v1201_v1, %v3072_v49  ;;  %v1209_v58 = vrot.slane %v3192_v5, %v2743_v63  ;;  %v1197_v29 = vrot.slane %v3192_v5, %v2657_v7 }
  0xf3   : > { %1919 = vmatpush2.msra.mxu0 %v1678_v15  ;;  %1990 = vmatpush2.msra.mxu1 %v1680_v33  ;;  %v1205_v44 = vrot.slane %v3192_v5, %v2662_v11  ;;  %v1647_v10 = vmul.f32 %v1201_v1, %v3287_v59  ;;  %v1169_v46 = vrot.slane %v3247_v17, %v2740_v62 }
  0xf4   : > { %1920 = vmatprep.subr.mxu0 %v1671_v16  ;;  %1991 = vmatprep.subr.mxu1 %v1673_v52  ;;  %v1657_v23 = vmul.f32 %v1209_v58, %v3294_v42  ;;  %v1654_v43 = vmul.f32 %v1197_v29, %v3306_v56  ;;  %v1649_v57 = vmul.f32 %v1209_v58, %v3311_v34 }
  0xf5   : > { %1921 = vmatpush2.msra.mxu0 %v1670_v32  ;;  %1992 = vmatpush2.msra.mxu1 %v1672_v22  ;;  %v1656_v50 = vmul.f32 %v1205_v44, %v3318_v47  ;;  %v1646_v54 = vmul.f32 %v1197_v29, %v3282_v25  ;;  %v1648_v5 = vmul.f32 %v1205_v44, %v3301_v53 }
  0xf6   : > { %1922 = vmatprep.subr.mxu0 %v1663_v40  ;;  %1993 = vmatprep.subr.mxu1 %v1665_v27  ;;  %v1639_v55 = vmul.f32 %v1169_v46, %v3072_v49  ;;  %v1177_v14 = vrot.slane %v3247_v17, %v2743_v63  ;;  %v1165_v36 = vrot.slane %v3247_v17, %v2657_v7 }
  0xf7   : > { %1923 = vmatpush2.msra.mxu0 %v1662_v60  ;;  %1994 = vmatpush2.msra.mxu1 %v1664_v0  ;;  %v1173_v37 = vrot.slane %v3247_v17, %v2662_v11  ;;  %v1631_v26 = vmul.f32 %v1169_v46, %v3287_v59  ;;  %v1137_v51 = vrot.slane %v3252_v19, %v2740_v62 }
  0xf8   : > { %1924 = vmatprep.subr.mxu0 %v1655_v48  ;;  %1995 = vmatprep.subr.mxu1 %v1657_v23  ;;  %v1641_v21 = vmul.f32 %v1177_v14, %v3294_v42  ;;  %v1638_v4 = vmul.f32 %v1165_v36, %v3306_v56  ;;  %v1633_v2 = vmul.f32 %v1177_v14, %v3311_v34 }
  0xf9   : > { %1925 = vmatpush2.msra.mxu0 %v1654_v43  ;;  %1996 = vmatpush2.msra.mxu1 %v1656_v50  ;;  %v1640_v61 = vmul.f32 %v1173_v37, %v3318_v47  ;;  %v1630_v13 = vmul.f32 %v1165_v36, %v3282_v25  ;;  %v1632_v17 = vmul.f32 %v1173_v37, %v3301_v53 }
  0xfa   : > { %1926 = vmatprep.subr.mxu0 %v1647_v10  ;;  %1997 = vmatprep.subr.mxu1 %v1649_v57  ;;  %v1145_v28 = vrot.slane %v3252_v19, %v2743_v63  ;;  %v1133_v45 = vrot.slane %v3252_v19, %v2657_v7  ;;  %v1141_v24 = vrot.slane %v3252_v19, %v2662_v11 }
  0xfb   : > { %1927 = vmatpush2.msra.mxu0 %v1646_v54  ;;  %1998 = vmatpush2.msra.mxu1 %v1648_v5  ;;  %v1623_v39 = vmul.f32 %v1137_v51, %v3072_v49  ;;  %v1105_v35 = vrot.slane %v3254_v9, %v2740_v62  ;;  %v1615_v6 = vmul.f32 %v1137_v51, %v3287_v59 }
  0xfc   : > { %1928 = vmatprep.subr.mxu0 %v1639_v55  ;;  %1999 = vmatprep.subr.mxu1 %v1641_v21  ;;  %v1625_v41 = vmul.f32 %v1145_v28, %v3294_v42  ;;  %v1622_v8 = vmul.f32 %v1133_v45, %v3306_v56  ;;  %v1624_v3 = vmul.f32 %v1141_v24, %v3318_v47 }
  0xfd   : > { %1929 = vmatpush2.msra.mxu0 %v1638_v4  ;;  %2000 = vmatpush2.msra.mxu1 %v1640_v61  ;;  %v1617_v19 = vmul.f32 %v1145_v28, %v3311_v34  ;;  %v1113_v31 = vrot.slane %v3254_v9, %v2743_v63  ;;  %v1101_v15 = vrot.slane %v3254_v9, %v2657_v7 }
  0xfe   : > { %1930 = vmatprep.subr.mxu0 %v1631_v26  ;;  %2001 = vmatprep.subr.mxu1 %v1633_v2  ;;  %v1614_v62 = vmul.f32 %v1133_v45, %v3282_v25  ;;  %v1616_v33 = vmul.f32 %v1141_v24, %v3301_v53  ;;  %v1109_v16 = vrot.slane %v3254_v9, %v2662_v11  ;;  %v3684_v9 = vld [vmem:[#allocation14_spill] sm:$0xff] }
  0xff   : > { %1931 = vmatpush2.msra.mxu0 %v1630_v13  ;;  %2002 = vmatpush2.msra.mxu1 %v1632_v17  ;;  %v1607_v12 = vmul.f32 %v1105_v35, %v3072_v49  ;;  %v1609_v30 = vmul.f32 %v1113_v31, %v3294_v42  ;;  %v1606_v63 = vmul.f32 %v1101_v15, %v3306_v56 }
 0x100   : > { %1932 = vmatprep.subr.mxu0 %v1623_v39  ;;  %2003 = vmatprep.subr.mxu1 %v1625_v41  ;;  %v1608_v7 = vmul.f32 %v1109_v16, %v3318_v47  ;;  %v1599_v38 = vmul.f32 %v1105_v35, %v3287_v59  ;;  %v1601_v40 = vmul.f32 %v1113_v31, %v3311_v34 }
 0x101   : > { %1933 = vmatpush2.msra.mxu0 %v1622_v8  ;;  %2004 = vmatpush2.msra.mxu1 %v1624_v3  ;;  %v1598_v11 = vmul.f32 %v1101_v15, %v3282_v25  ;;  %v1600_v49 = vmul.f32 %v1109_v16, %v3301_v53 }
 0x102   : > { %1934 = vmatprep.subr.mxu0 %v1615_v6  ;;  %2005 = vmatprep.subr.mxu1 %v1617_v19 }
 0x103   : > { %1935 = vmatpush2.msra.mxu0 %v1614_v62  ;;  %2006 = vmatpush2.msra.mxu1 %v1616_v33 }
 0x104   : > { %1936 = vmatprep.subr.mxu0 %v1607_v12  ;;  %2007 = vmatprep.subr.mxu1 %v1609_v30 }
 0x105   : > { %1937 = vmatpush2.msra.mxu0 %v1606_v63  ;;  %2008 = vmatpush2.msra.mxu1 %v1608_v7 }
 0x106   : > { %1938 = vmatprep.subr.mxu0 %v1599_v38  ;;  %2009 = vmatprep.subr.mxu1 %v1601_v40 }
 0x107   : > { %1939 = vmatpush2.msra.mxu0 %v1598_v11  ;;  %1940 = vmatprep.mubr.f32.mxu0 %v3684_v9 }
 0x108   : > { %2010 = vmatpush2.msra.mxu1 %v1600_v49  ;;  %2011 = vmatprep.mubr.f32.mxu1 %v3684_v9 }
 0x109   : > { %1941 = vmatmul.mubr.f32.vlgmr.msra.gmra.mxu0 %v2752_v20  ;;  %2012 = vmatmul.mubr.f32.vlgmr.msra.gmra.mxu1 %v2752_v20 }
 0x187   : > { %v1800_v25 = vpop.f32.mrf.mxu0  ;;  %v1871_v59 = vpop.f32.mrf.mxu1 }
 0x189   : > { %v1802_v42 = vpop.f32.mrf.mxu0  ;;  %v1873_v53 = vpop.f32.mrf.mxu1 }
 0x18a   : > { %v2026_v56 = vcombine.low %v1800_v25, %v1802_v42  ;;  %v2027_v34 = vcombine.low %v1871_v59, %v1873_v53 }
 0x18c   : > { %v2036_v52 = vrot.slane %v2026_v56, %v2746_v18  ;;  %v2043_v32 = vrot.slane %v2027_v34, %v2746_v18 }
 0x18e   : > { %v2058_v0 = vcombine.low %v2036_v52, %v2043_v32 }
 0x190   : > { %v2066_v44 = vrot.slane %v2058_v0, %v2746_v18 }
 0x1c9   : > { %v1942_v47 = vpop.f32.mrf.mxu0  ;;  %v2013_v1 = vpop.f32.mrf.mxu1 }
 0x1cb   : > { %v1944_v27 = vpop.f32.mrf.mxu0  ;;  %v2015_v22 = vpop.f32.mrf.mxu1 }
 0x1cc   : > { %v2028_v60 = vcombine.low %v1942_v47, %v1944_v27  ;;  %v2029_v20 = vcombine.low %v2013_v1, %v2015_v22 }
 0x1ce   : > { %v2050_v48 = vrot.slane %v2028_v60, %v2746_v18  ;;  %v2057_v58 = vrot.slane %v2029_v20, %v2746_v18 }
 0x1d0   : > { %v2059_v29 = vcombine.low %v2050_v48, %v2057_v58 }
 0x1d2   : > { %v2073_v10 = vrot.slane %v2059_v29, %v2746_v18 }
 0x1d4   : > { %v2074_v46 = vcombine.low %v2066_v44, %v2073_v10 }
 0x1d6   : > { %2076 = vst [vmem:[%s243_s3] sm:$0xff] %v2074_v46 }
 0x1d7   : > { %2396 = shalt.err (!%p2393_p1)
}
 0x1d8   : > { %s2397_s8 = scalar_lea.hbm %s2094_s4, 128  ;;  %s2401_s15 = scalar_lea.hbm %s3641_s2, 1024 }
 0x1d9   : > { %p2398_p2 = scmp.ne.s32.totalorder %s2094_s4, %s2397_s8  ;;  %p2402_p10 = scmp.lt.s32.totalorder %s2094_s4, %s3641_s2 }
 0x1da   : > { %p2403_p11 = scmp.lt.s32.totalorder %s2401_s15, %s2397_s8 }
 0x1db   : > { %p2399_p3 = pnand %p2398_p2, %p2569_p9 }
 0x1dc   : > { %p2404_p8 = por %p2403_p11, %p2402_p10 }
 0x1dd   : > { %p2400_p7 = pneg %p2399_p3 }
 0x1df   : > { %p2405_p0 = pnand %p2404_p8, %p2400_p7 }
 0x1e1   : > { %2408 = shalt.err (!%p2405_p0)
}
 0x1e2   : > { %2247 = dma.vmem_to_hbm [thread:$0]  (%p2569_p9), %s2097_s23, 128, %s2094_s4, %s2078_s5  }
 0x1e3 PF: > { %p2261_p4 = scmp.ge.s32.totalorder %s2483_s16, 2  ;;  %s2108_s24 = sand.u32 1, %s2455_s9  }
 0x1e4   : > { %s2109_s18 = scalar_lea.sflag [#allocation4], %s2108_s24 }
 0x1e5   : > { %p2257_p13 = pnand %p2261_p4, %p2575_p12 }
 0x1e7   : > { %p2258_p5 = pneg %p2257_p13 }
 0x1e9   : > { %2450 = dma.done.wait (%p2258_p5), %s2109_s18, 128  }
 0x1ea   : > { %2452 = vsyncadd (%p2258_p5), %s2109_s18, 4294967168  ;;  %s21_s16 = sadd.s32 1, %s2483_s16   ;;  %s3685_s13 = sld [smem:[#allocation11_spill]] }
 0x1eb   : > { %p18_p6 = scmp.ge.s32.totalorder %s21_s16, 10   ;;  %s3686_s25 = sld [smem:[#allocation12_spill]] }
 0x1ec   : > { %s3687_s15 = sld [smem:[#allocation13_spill]]  ;;  %s3688_s9 = smov %s2459_s10 }
 0x1ed   : > { %s3689_s10 = smov %s2463_s11  ;;  %s3690_s11 = smov %s2584_s30 }
 0x1ee   : > { %s3691_s12 = smov %s2475_s14  ;;  %20 = sbr.rel (!%p18_p6) target bundleno = 11 (0xb), region = 86 }
 0x1f1   : > { %s3692_s14 = smov %s3686_s25 }
 0x1f3   :  { %2114 = vsyncpa [#allocation3], 1 }
 0x1f4   :  { %2116 = vsyncpa [#allocation3 + $0x1], 1 }
 0x1f5   :  { %2117 = vsyncpa [#allocation6], 1 }
 0x1f6   :  { %2119 = vsyncpa [#allocation6 + $0x1], 1 }
 0x1f7   :  { %2120 = vsyncpa [#allocation4], 1 }
 0x1f8   :  { %2122 = vsyncpa [#allocation4 + $0x1], 1 }

</bundles_post_ra>
